<compile_context>
chip_gen: v7x
topology: tpu7x:2x2x1
jax: 0.10.0
libtpu: 0.0.40
codegen_flags: <defaults>
</compile_context>

<pallas_src>
import jax
import jax.numpy as jnp
from jax import lax
from jax.experimental import pallas as pl
from jax.experimental.pallas import tpu as pltpu


# ----------------------------------------------------------------------------
# One fused kernel: all matmuls + all losses, single invocation (no grid).
# ----------------------------------------------------------------------------
def _fused_transformer_kernel(masked_ref, dropped_ref, orig_ref,
                              w_all_ref, p1_w_ref, p2_w_ref,
                              da_w1_ref, da_w2_ref, bias_ref,
                              feat_ref, loss_ref):
    f32 = jnp.float32
    bf16 = jnp.bfloat16

    n = masked_ref.shape[0]          # nodes per branch
    h = p1_w_ref.shape[0]            # hidden_dim (encoder output width)
    o = p2_w_ref.shape[1]            # output_dim (projector output width)
    d_dec = da_w1_ref.shape[0]       # 512 (decoder / token-embedding width)

    # --- static slices of the packed bias vector (free) ----------------------
    off = 0
    b_edt = bias_ref[:, off:off + h + 2 * d_dec]     # enc|dec|tok bias [1, H+1024]
    off += h + 2 * d_dec
    b_p1 = bias_ref[:, off:off + h]
    off += h
    b_p2 = bias_ref[:, off:off + o]
    off += o
    b_da = bias_ref[:, off:off + d_dec]

    # --- stack the three activation blocks in-VMEM (no HBM concat trip) ------
    x = jnp.concatenate(
        [masked_ref[...], dropped_ref[...], orig_ref[...]], axis=0
    ).astype(bf16)                                                   # [3N, D_in]

    # --- single MXU pass: encoder | decoder | token embedding ----------------
    y = jnp.dot(x, w_all_ref[...],
                preferred_element_type=f32) + b_edt                 # [3N, H+1024]

    z_enc = y[:2 * n, :h]                                           # [2N, H]
    z_masked = z_enc[:n]                                            # [N, H]
    z_dropped = z_enc[n:]                                           # [N, H]
    z_rmask = y[:n, h:h + d_dec]                                    # [N, 512]
    z_rdrop = y[n:2 * n, h:h + d_dec]                               # [N, 512]
    z_original = y[2 * n:, h + d_dec:]                              # [N, 512]

    # --- projector (Linear -> ReLU -> Linear), both branches stacked ---------
    hid = jnp.maximum(
        jnp.dot(z_enc.astype(bf16), p1_w_ref[...],
                preferred_element_type=f32) + b_p1, 0.0)            # [2N, H]
    cf = (jnp.dot(hid.astype(bf16), p2_w_ref[...],
                  preferred_element_type=f32) + b_p2)               # [2N, O]
    cf_masked = cf[:n]
    cf_dropped = cf[n:]

    # --- dim_adjuster on virtual concat(z_rmask, z_rdrop) (no HBM trip) ------
    adj = (jnp.dot(z_rmask.astype(bf16), da_w1_ref[...],
                   preferred_element_type=f32)
           + jnp.dot(z_rdrop.astype(bf16), da_w2_ref[...],
                     preferred_element_type=f32)
           + b_da)                                                  # [N, 512]

    # --- fused losses (all f32) -----------------------------------------------
    # contrastive: F.normalize(p=2, dim=1) on both, then diag(z1 @ z2.T)
    # => rowwise cosine.  Rewritten with rsqrt on clamped sum-of-squares
    # (rsqrt(max(ss, eps^2)) == 1 / max(||v||, eps), eps = 1e-12 as F.normalize).
    eps2 = jnp.float32(1e-24)
    ss_a = jnp.sum(cf_masked * cf_masked, axis=1, keepdims=True)
    ss_b = jnp.sum(cf_dropped * cf_dropped, axis=1, keepdims=True)
    dot_ab = jnp.sum(cf_masked * cf_dropped, axis=1, keepdims=True)
    cos = dot_ab * lax.rsqrt(jnp.maximum(ss_a, eps2)) \
                 * lax.rsqrt(jnp.maximum(ss_b, eps2))
    c_loss = jnp.mean(1.0 - cos)

    # reconstruction losses: F.mse_loss (mean over all elements)
    d1 = z_rmask - z_original
    d2 = z_rdrop - z_original
    d3 = adj - z_original
    r_mask = jnp.mean(d1 * d1)
    r_drop = jnp.mean(d2 * d2)
    r_cat = jnp.mean(d3 * d3)

    # variance_discriminative_loss: sum over columns of torch.var(z, dim=0)
    # (per-column mean, unbiased divisor N-1); guard n == 1.
    mu = jnp.mean(z_masked, axis=0, keepdims=True)
    dv = z_masked - mu
    var_loss = jnp.sum(dv * dv) / jnp.float32(max(n - 1, 1))

    loss_ref[0, 0] = c_loss + r_mask + r_drop + r_cat + var_loss

    # --- final_features = concat(z_masked, z_dropped, axis=-1) ---------------
    feat_ref[:, :h] = z_masked
    feat_ref[:, h:] = z_dropped


def fused_forward(masked_features, features_with_dropped, original_features, kp):
    n = masked_features.shape[0]
    h = kp["p1_w"].shape[0]
    return pl.pallas_call(
        _fused_transformer_kernel,
        out_shape=(jax.ShapeDtypeStruct((n, 2 * h), jnp.float32),
                   jax.ShapeDtypeStruct((1, 1), jnp.float32)),
        in_specs=[pl.BlockSpec(memory_space=pltpu.MemorySpace.VMEM)] * 9,
        out_specs=(pl.BlockSpec(memory_space=pltpu.MemorySpace.VMEM),
                   pl.BlockSpec(memory_space=pltpu.MemorySpace.SMEM)),
    )(masked_features, features_with_dropped, original_features,
      kp["w_all"], kp["p1_w"], kp["p2_w"],
      kp["da_w1"], kp["da_w2"], kp["bias"])


# ----------------------------------------------------------------------------
# Parameter construction (deterministic, nn.Linear-style init)
# ----------------------------------------------------------------------------
def _init_linear(key, d_in, d_out):
    kw, kb = jax.random.split(key)
    bound = 1.0 / jnp.sqrt(jnp.float32(d_in))
    w = jax.random.uniform(kw, (d_in, d_out), jnp.float32, -bound, bound)
    b = jax.random.uniform(kb, (d_out,), jnp.float32, -bound, bound)
    return w, b


def make_params(key, input_dim, hidden_dim, output_dim, final_dim):
    keys = jax.random.split(key, 9)
    p = {}
    p["encoder"] = _init_linear(keys[0], input_dim, hidden_dim)     # encoder stand-in
    p["token"] = _init_linear(keys[1], input_dim, 512)              # token-embedding stand-in
    p["decoder"] = _init_linear(keys[2], input_dim, 512)            # LSTM decoder stand-in
    p["proj1"] = _init_linear(keys[3], hidden_dim, hidden_dim)
    p["proj2"] = _init_linear(keys[4], hidden_dim, output_dim)
    p["gen_mapper"] = _init_linear(keys[5], hidden_dim, final_dim)  # unused in forward
    p["con_mapper"] = _init_linear(keys[6], output_dim, final_dim)  # unused in forward
    p["mask_mapper"] = _init_linear(keys[7], input_dim, final_dim)  # unused in forward
    p["dim_adjuster"] = _init_linear(keys[8], 1024, 512)
    return p


def prepare_kernel_params(p):
    """One-time prep: fuse encoder|decoder|token weights into one RHS, pack all
    biases into one [1, total] f32 vector, split dim_adjuster, cast matmul
    weights to bf16 (biases stay f32)."""
    enc_w, enc_b = p["encoder"]
    dec_w, dec_b = p["decoder"]
    tok_w, tok_b = p["token"]
    p1_w, p1_b = p["proj1"]
    p2_w, p2_b = p["proj2"]
    da_w, da_b = p["dim_adjuster"]
    d_dec = dec_w.shape[1]  # 512
    w_all = jnp.concatenate([enc_w, dec_w, tok_w], axis=1).astype(jnp.bfloat16)
    bias = jnp.concatenate([enc_b, dec_b, tok_b, p1_b, p2_b, da_b]).reshape(1, -1)
    return {
        "w_all": w_all,                              # [D_in, H+1024] bf16
        "bias": bias,                                # [1, H+1024+H+O+512] f32
        "p1_w": p1_w.astype(jnp.bfloat16),
        "p2_w": p2_w.astype(jnp.bfloat16),
        "da_w1": da_w[:d_dec].astype(jnp.bfloat16),
        "da_w2": da_w[d_dec:].astype(jnp.bfloat16),
    }


# ----------------------------------------------------------------------------
# Forward pass (mirrors Transformer.forward) — single pallas_call, no wrapper
# concat (activation blocks are stacked inside the kernel).
# ----------------------------------------------------------------------------
@jax.jit
def transformer_forward(kparams, node_id, masked_graph, dropped_graph,
                        masked_features, remaining_nodes, original_features,
                        original_graph, features_with_dropped):
    # TODO(synk): id / graph / remaining_nodes inputs unused (graph submodules
    # are undefined in the reference file).
    final_features, loss = fused_forward(
        masked_features, features_with_dropped, original_features, kparams)
    return final_features, loss[0, 0]


# ----------------------------------------------------------------------------
if __name__ == "__main__":
    N = 16            # number of nodes (multiple of 16 keeps bf16 row splits aligned)
    INPUT_DIM = 128
    HIDDEN_DIM = 128
    OUTPUT_DIM = 128
    FINAL_DIM = 128

    root = jax.random.PRNGKey(0)
    kp_key, k1, k2, k3 = jax.random.split(root, 4)

    params = make_params(kp_key, INPUT_DIM, HIDDEN_DIM, OUTPUT_DIM, FINAL_DIM)
    kparams = prepare_kernel_params(params)

    node_id = jnp.arange(N, dtype=jnp.int32)
    remaining_nodes = jnp.arange(N, dtype=jnp.int32)
    masked_graph = jnp.ones((N, N), jnp.float32)
    dropped_graph = jnp.ones((N, N), jnp.float32)
    original_graph = jnp.ones((N, N), jnp.float32)

    masked_features = jax.random.normal(k1, (N, INPUT_DIM), jnp.float32)
    original_features = jax.random.normal(k2, (N, INPUT_DIM), jnp.float32)
    features_with_dropped = jax.random.normal(k3, (N, INPUT_DIM), jnp.float32)

    final_features, total_loss = transformer_forward(
        kparams, node_id, masked_graph, dropped_graph, masked_features,
        remaining_nodes, original_features, original_graph,
        features_with_dropped)

    jax.block_until_ready((final_features, total_loss))
    assert final_features.shape == (N, 2 * HIDDEN_DIM)
    assert total_loss.shape == ()
    assert bool(jnp.isfinite(total_loss))
    print("KERNEL_OK")
</pallas_src>

<mosaic_0001>
module attributes {stable_mosaic.version = 11 : i64} {
  func.func @_fused_transformer_kernel(%arg0: memref<16x128xf32, #tpu.memory_space<vmem>>, %arg1: memref<16x128xf32, #tpu.memory_space<vmem>>, %arg2: memref<16x128xf32, #tpu.memory_space<vmem>>, %arg3: memref<128x1152xbf16, #tpu.memory_space<vmem>>, %arg4: memref<128x128xbf16, #tpu.memory_space<vmem>>, %arg5: memref<128x128xbf16, #tpu.memory_space<vmem>>, %arg6: memref<512x512xbf16, #tpu.memory_space<vmem>>, %arg7: memref<512x512xbf16, #tpu.memory_space<vmem>>, %arg8: memref<1x1920xf32, #tpu.memory_space<vmem>>, %arg9: memref<16x256xf32, #tpu.memory_space<vmem>>, %arg10: memref<1x1xf32, #tpu.memory_space<smem>>) attributes {dimension_semantics = [], scalar_prefetch = 0 : i64, scratch_operands = 0 : i64, tpu.core_type = #tpu.core_type<tc>} {
    %c0 = arith.constant 0 : index
    %c0_0 = arith.constant 0 : index
    %0 = vector.load %arg8[%c0, %c0_0] : memref<1x1920xf32, #tpu.memory_space<vmem>>, vector<1x1152xf32>
    %c0_1 = arith.constant 0 : index
    %c1152 = arith.constant 1152 : index
    %1 = vector.load %arg8[%c0_1, %c1152] : memref<1x1920xf32, #tpu.memory_space<vmem>>, vector<1x128xf32>
    %c0_2 = arith.constant 0 : index
    %c1280 = arith.constant 1280 : index
    %2 = vector.load %arg8[%c0_2, %c1280] : memref<1x1920xf32, #tpu.memory_space<vmem>>, vector<1x128xf32>
    %c0_3 = arith.constant 0 : index
    %c1408 = arith.constant 1408 : index
    %3 = vector.load %arg8[%c0_3, %c1408] : memref<1x1920xf32, #tpu.memory_space<vmem>>, vector<1x512xf32>
    %c0_4 = arith.constant 0 : index
    %c0_5 = arith.constant 0 : index
    %4 = vector.load %arg0[%c0_4, %c0_5] : memref<16x128xf32, #tpu.memory_space<vmem>>, vector<16x128xf32>
    %c0_6 = arith.constant 0 : index
    %c0_7 = arith.constant 0 : index
    %5 = vector.load %arg1[%c0_6, %c0_7] : memref<16x128xf32, #tpu.memory_space<vmem>>, vector<16x128xf32>
    %c0_8 = arith.constant 0 : index
    %c0_9 = arith.constant 0 : index
    %6 = vector.load %arg2[%c0_8, %c0_9] : memref<16x128xf32, #tpu.memory_space<vmem>>, vector<16x128xf32>
    %7 = tpu.concatenate %4, %5, %6 in 0 : vector<16x128xf32>, vector<16x128xf32>, vector<16x128xf32> -> vector<48x128xf32>
    %8 = arith.truncf %7 : vector<48x128xf32> to vector<48x128xbf16>
    %c0_10 = arith.constant 0 : index
    %c0_11 = arith.constant 0 : index
    %9 = vector.load %arg3[%c0_10, %c0_11] : memref<128x1152xbf16, #tpu.memory_space<vmem>>, vector<128x1152xbf16>
    %cst = arith.constant dense<0.000000e+00> : vector<48x1152xf32>
    %10 = tpu.matmul %8, %9, %cst {dimension_numbers = #tpu.dot_dimension_numbers<[1], [0], [0], [1], [0, 0, 1, 1], [], []>} : vector<48x128xbf16>, vector<128x1152xbf16>, vector<48x1152xf32> -> vector<48x1152xf32>
    %11 = vector.broadcast %0 : vector<1x1152xf32> to vector<48x1152xf32>
    %12 = arith.addf %10, %11 : vector<48x1152xf32>
    %13 = vector.extract_strided_slice %12 {offsets = [0, 0], sizes = [32, 128], strides = [1, 1]} : vector<48x1152xf32> to vector<32x128xf32>
    %14 = vector.extract_strided_slice %13 {offsets = [0, 0], sizes = [16, 128], strides = [1, 1]} : vector<32x128xf32> to vector<16x128xf32>
    %15 = vector.extract_strided_slice %13 {offsets = [16, 0], sizes = [16, 128], strides = [1, 1]} : vector<32x128xf32> to vector<16x128xf32>
    %16 = vector.extract_strided_slice %12 {offsets = [0, 128], sizes = [16, 512], strides = [1, 1]} : vector<48x1152xf32> to vector<16x512xf32>
    %17 = vector.extract_strided_slice %12 {offsets = [16, 128], sizes = [16, 512], strides = [1, 1]} : vector<48x1152xf32> to vector<16x512xf32>
    %18 = vector.extract_strided_slice %12 {offsets = [32, 640], sizes = [16, 512], strides = [1, 1]} : vector<48x1152xf32> to vector<16x512xf32>
    %19 = arith.truncf %13 : vector<32x128xf32> to vector<32x128xbf16>
    %c0_12 = arith.constant 0 : index
    %c0_13 = arith.constant 0 : index
    %20 = vector.load %arg4[%c0_12, %c0_13] : memref<128x128xbf16, #tpu.memory_space<vmem>>, vector<128x128xbf16>
    %cst_14 = arith.constant dense<0.000000e+00> : vector<32x128xf32>
    %21 = tpu.matmul %19, %20, %cst_14 {dimension_numbers = #tpu.dot_dimension_numbers<[1], [0], [0], [1], [0, 0, 1, 1], [], []>} : vector<32x128xbf16>, vector<128x128xbf16>, vector<32x128xf32> -> vector<32x128xf32>
    %22 = vector.broadcast %1 : vector<1x128xf32> to vector<32x128xf32>
    %23 = arith.addf %21, %22 : vector<32x128xf32>
    %cst_15 = arith.constant 0.000000e+00 : f32
    %24 = vector.broadcast %cst_15 : f32 to vector<32x128xf32>
    %25 = arith.maximumf %23, %24 : vector<32x128xf32>
    %26 = arith.truncf %25 : vector<32x128xf32> to vector<32x128xbf16>
    %c0_16 = arith.constant 0 : index
    %c0_17 = arith.constant 0 : index
    %27 = vector.load %arg5[%c0_16, %c0_17] : memref<128x128xbf16, #tpu.memory_space<vmem>>, vector<128x128xbf16>
    %cst_18 = arith.constant dense<0.000000e+00> : vector<32x128xf32>
    %28 = tpu.matmul %26, %27, %cst_18 {dimension_numbers = #tpu.dot_dimension_numbers<[1], [0], [0], [1], [0, 0, 1, 1], [], []>} : vector<32x128xbf16>, vector<128x128xbf16>, vector<32x128xf32> -> vector<32x128xf32>
    %29 = vector.broadcast %2 : vector<1x128xf32> to vector<32x128xf32>
    %30 = arith.addf %28, %29 : vector<32x128xf32>
    %31 = vector.extract_strided_slice %30 {offsets = [0, 0], sizes = [16, 128], strides = [1, 1]} : vector<32x128xf32> to vector<16x128xf32>
    %32 = vector.extract_strided_slice %30 {offsets = [16, 0], sizes = [16, 128], strides = [1, 1]} : vector<32x128xf32> to vector<16x128xf32>
    %33 = arith.truncf %16 : vector<16x512xf32> to vector<16x512xbf16>
    %c0_19 = arith.constant 0 : index
    %c0_20 = arith.constant 0 : index
    %34 = vector.load %arg6[%c0_19, %c0_20] : memref<512x512xbf16, #tpu.memory_space<vmem>>, vector<512x512xbf16>
    %cst_21 = arith.constant dense<0.000000e+00> : vector<16x512xf32>
    %35 = tpu.matmul %33, %34, %cst_21 {dimension_numbers = #tpu.dot_dimension_numbers<[1], [0], [0], [1], [0, 0, 1, 1], [], []>} : vector<16x512xbf16>, vector<512x512xbf16>, vector<16x512xf32> -> vector<16x512xf32>
    %36 = arith.truncf %17 : vector<16x512xf32> to vector<16x512xbf16>
    %c0_22 = arith.constant 0 : index
    %c0_23 = arith.constant 0 : index
    %37 = vector.load %arg7[%c0_22, %c0_23] : memref<512x512xbf16, #tpu.memory_space<vmem>>, vector<512x512xbf16>
    %cst_24 = arith.constant dense<0.000000e+00> : vector<16x512xf32>
    %38 = tpu.matmul %36, %37, %cst_24 {dimension_numbers = #tpu.dot_dimension_numbers<[1], [0], [0], [1], [0, 0, 1, 1], [], []>} : vector<16x512xbf16>, vector<512x512xbf16>, vector<16x512xf32> -> vector<16x512xf32>
    %39 = arith.addf %35, %38 : vector<16x512xf32>
    %40 = vector.broadcast %3 : vector<1x512xf32> to vector<16x512xf32>
    %41 = arith.addf %39, %40 : vector<16x512xf32>
    %42 = arith.mulf %31, %31 : vector<16x128xf32>
    %cst_25 = arith.constant dense<0.000000e+00> : vector<16xf32>
    %43 = vector.multi_reduction <add>, %42, %cst_25 [1] : vector<16x128xf32> to vector<16xf32>
    %44 = vector.shape_cast %43 : vector<16xf32> to vector<16x1xf32>
    %45 = arith.mulf %32, %32 : vector<16x128xf32>
    %cst_26 = arith.constant dense<0.000000e+00> : vector<16xf32>
    %46 = vector.multi_reduction <add>, %45, %cst_26 [1] : vector<16x128xf32> to vector<16xf32>
    %47 = vector.shape_cast %46 : vector<16xf32> to vector<16x1xf32>
    %48 = arith.mulf %31, %32 : vector<16x128xf32>
    %cst_27 = arith.constant dense<0.000000e+00> : vector<16xf32>
    %49 = vector.multi_reduction <add>, %48, %cst_27 [1] : vector<16x128xf32> to vector<16xf32>
    %50 = vector.shape_cast %49 : vector<16xf32> to vector<16x1xf32>
    %cst_28 = arith.constant 1.000000e-24 : f32
    %51 = vector.broadcast %cst_28 : f32 to vector<16x1xf32>
    %52 = arith.maximumf %44, %51 : vector<16x1xf32>
    %53 = math.rsqrt %52 : vector<16x1xf32>
    %54 = arith.mulf %50, %53 : vector<16x1xf32>
    %cst_29 = arith.constant 1.000000e-24 : f32
    %55 = vector.broadcast %cst_29 : f32 to vector<16x1xf32>
    %56 = arith.maximumf %47, %55 : vector<16x1xf32>
    %57 = math.rsqrt %56 : vector<16x1xf32>
    %58 = arith.mulf %54, %57 : vector<16x1xf32>
    %cst_30 = arith.constant 1.000000e+00 : f32
    %59 = vector.broadcast %cst_30 : f32 to vector<16x1xf32>
    %60 = arith.subf %59, %58 : vector<16x1xf32>
    %61 = vector.shape_cast %60 : vector<16x1xf32> to vector<1x16x1xf32>
    %cst_31 = arith.constant dense<0.000000e+00> : vector<1xf32>
    %62 = vector.multi_reduction <add>, %61, %cst_31 [1, 2] : vector<1x16x1xf32> to vector<1xf32>
    %63 = vector.shape_cast %62 : vector<1xf32> to vector<1x1x1xf32>
    %64 = vector.extract %63[0, 0, 0] : f32 from vector<1x1x1xf32>
    %cst_32 = arith.constant 1.600000e+01 : f32
    %65 = arith.divf %64, %cst_32 : f32
    %66 = arith.subf %16, %18 : vector<16x512xf32>
    %67 = arith.subf %17, %18 : vector<16x512xf32>
    %68 = arith.subf %41, %18 : vector<16x512xf32>
    %69 = arith.mulf %66, %66 : vector<16x512xf32>
    %70 = vector.shape_cast %69 : vector<16x512xf32> to vector<1x16x512xf32>
    %cst_33 = arith.constant dense<0.000000e+00> : vector<1xf32>
    %71 = vector.multi_reduction <add>, %70, %cst_33 [1, 2] : vector<1x16x512xf32> to vector<1xf32>
    %72 = vector.shape_cast %71 : vector<1xf32> to vector<1x1x1xf32>
    %73 = vector.extract %72[0, 0, 0] : f32 from vector<1x1x1xf32>
    %cst_34 = arith.constant 8.192000e+03 : f32
    %74 = arith.divf %73, %cst_34 : f32
    %75 = arith.mulf %67, %67 : vector<16x512xf32>
    %76 = vector.shape_cast %75 : vector<16x512xf32> to vector<1x16x512xf32>
    %cst_35 = arith.constant dense<0.000000e+00> : vector<1xf32>
    %77 = vector.multi_reduction <add>, %76, %cst_35 [1, 2] : vector<1x16x512xf32> to vector<1xf32>
    %78 = vector.shape_cast %77 : vector<1xf32> to vector<1x1x1xf32>
    %79 = vector.extract %78[0, 0, 0] : f32 from vector<1x1x1xf32>
    %cst_36 = arith.constant 8.192000e+03 : f32
    %80 = arith.divf %79, %cst_36 : f32
    %81 = arith.mulf %68, %68 : vector<16x512xf32>
    %82 = vector.shape_cast %81 : vector<16x512xf32> to vector<1x16x512xf32>
    %cst_37 = arith.constant dense<0.000000e+00> : vector<1xf32>
    %83 = vector.multi_reduction <add>, %82, %cst_37 [1, 2] : vector<1x16x512xf32> to vector<1xf32>
    %84 = vector.shape_cast %83 : vector<1xf32> to vector<1x1x1xf32>
    %85 = vector.extract %84[0, 0, 0] : f32 from vector<1x1x1xf32>
    %cst_38 = arith.constant 8.192000e+03 : f32
    %86 = arith.divf %85, %cst_38 : f32
    %cst_39 = arith.constant dense<0.000000e+00> : vector<128xf32>
    %87 = vector.multi_reduction <add>, %14, %cst_39 [0] : vector<16x128xf32> to vector<128xf32>
    %88 = vector.shape_cast %87 : vector<128xf32> to vector<1x128xf32>
    %cst_40 = arith.constant 1.600000e+01 : f32
    %89 = vector.broadcast %cst_40 : f32 to vector<1x128xf32>
    %90 = arith.divf %88, %89 : vector<1x128xf32>
    %91 = vector.broadcast %90 : vector<1x128xf32> to vector<16x128xf32>
    %92 = arith.subf %14, %91 : vector<16x128xf32>
    %93 = arith.mulf %92, %92 : vector<16x128xf32>
    %94 = vector.shape_cast %93 : vector<16x128xf32> to vector<1x16x128xf32>
    %cst_41 = arith.constant dense<0.000000e+00> : vector<1xf32>
    %95 = vector.multi_reduction <add>, %94, %cst_41 [1, 2] : vector<1x16x128xf32> to vector<1xf32>
    %96 = vector.shape_cast %95 : vector<1xf32> to vector<1x1x1xf32>
    %97 = vector.extract %96[0, 0, 0] : f32 from vector<1x1x1xf32>
    %cst_42 = arith.constant 1.500000e+01 : f32
    %98 = arith.divf %97, %cst_42 : f32
    %99 = arith.addf %65, %74 : f32
    %100 = arith.addf %99, %80 : f32
    %101 = arith.addf %100, %86 : f32
    %102 = arith.addf %101, %98 : f32
    %c0_43 = arith.constant 0 : index
    %c0_44 = arith.constant 0 : index
    %103 = memref.load %arg10[%c0_43, %c0_44] : memref<1x1xf32, #tpu.memory_space<smem>>
    memref.store %102, %arg10[%c0_43, %c0_44] : memref<1x1xf32, #tpu.memory_space<smem>>
    %c0_45 = arith.constant 0 : index
    %c0_46 = arith.constant 0 : index
    %104 = vector.load %arg9[%c0_45, %c0_46] : memref<16x256xf32, #tpu.memory_space<vmem>>, vector<16x128xf32>
    tpu.vector_store %arg9[%c0_45, %c0_46], %14 {strides = array<i32>} : memref<16x256xf32, #tpu.memory_space<vmem>>, vector<16x128xf32>,
    %c0_47 = arith.constant 0 : index
    %c128 = arith.constant 128 : index
    %105 = vector.load %arg9[%c0_47, %c128] : memref<16x256xf32, #tpu.memory_space<vmem>>, vector<16x128xf32>
    tpu.vector_store %arg9[%c0_47, %c128], %15 {strides = array<i32>} : memref<16x256xf32, #tpu.memory_space<vmem>>, vector<16x128xf32>,
    return
  }
}

</mosaic_0001>

<bundles_post_ra>
// kernel: transformer_forward.1
= control target key start
LH: loop header
LB: loop body
LE: loop exit
PB: predicated region body
PF: predicated region fallthrough
CT: control target
= control target key end

     0   :  { %16 = vsyncpa [#allocation3], 0  ;;  %s5031_s0 = inlined_call_operand.vmem [shape: f32[16,128], index: 0, kind: input, shape index: {}]   ;;  %s5032_s1 = inlined_call_operand.hbm [shape: f32[16,128], index: 1, kind: input, shape index: {}]   ;;  %s5033_s2 = inlined_call_operand.hbm [shape: f32[16,128], index: 2, kind: input, shape index: {}]   ;;  %s5034_s3 = inlined_call_operand.hbm [shape: bf16[128,1152], index: 3, kind: input, shape index: {}]   ;;  %s5035_s4 = inlined_call_operand.hbm [shape: bf16[128,128], index: 4, kind: input, shape index: {}]   ;;  %s5036_s5 = inlined_call_operand.hbm [shape: bf16[128,128], index: 5, kind: input, shape index: {}]   ;;  %s5037_s6 = inlined_call_operand.hbm [shape: bf16[512,512], index: 6, kind: input, shape index: {}]   ;;  %s5038_s7 = inlined_call_operand.hbm [shape: bf16[512,512], index: 7, kind: input, shape index: {}]   ;;  %s5039_s8 = inlined_call_operand.hbm [shape: f32[1,1920], index: 8, kind: input, shape index: {}]   ;;  %s5040_s9 = inlined_call_operand.hbm [shape: f32[16,256], index: 9, kind: output, shape index: {0}]   ;;  %s5041_s10 = inlined_call_operand.hbm [shape: f32[1,1], index: 10, kind: output, shape index: {1}]  }
   0x1   :  { %17 = vsyncpa [#allocation7], 0 }
   0x2   :  { %18 = vsyncpa [#allocation10], 0 }
   0x3   :  { %19 = vsyncpa [#allocation13], 0 }
   0x4   :  { %20 = vsyncpa [#allocation16], 0 }
   0x5   :  { %21 = vsyncpa [#allocation4], 0 }
   0x6   :  { %22 = vsyncpa [#allocation5], 0  ;;  %s4557_s13 = smov [#allocation6]   ;;  %s4558_s15 = smov [#allocation9]  }
   0x7   :  { %s42_s14 = sshll.u32 %s4557_s13, 4  ;;  %s66_s16 = sshll.u32 %s4558_s15, 4  ;;  %s43_s14 = int_to_ptr.vmem [resolvable:$true] %s42_s14  ;;  %s4633_s16 = int_to_ptr.vmem [resolvable:$true] %s66_s16 }
   0x8   :  { %s4335_s19 = scalar_lea.hbm %s5033_s2, 256 }
   0x9   :  { %p4336_p0 = scmp.ne.s32.totalorder %s5033_s2, %s4335_s19  ;;  %p4339_p1 = scmp.lt.u32.totalorder %s4335_s19, %s5033_s2 }
   0xb   :  { %p4341_p2 = pnand %p4339_p1, %p4336_p0 }
   0xd   :  { %4344 = shalt.err (!%p4341_p2)
}
   0xe   :  { %s4345_s24 = scalar_lea.vmem %s43_s14, 256  ;;  %p4350_p4 = scmp.lt.s32.totalorder %s43_s14, %s43_s14 }
   0xf   :  { %p4346_p3 = scmp.ne.s32.totalorder %s43_s14, %s4345_s24  ;;  %p4351_p5 = scmp.lt.s32.totalorder %s4345_s24, %s4345_s24 }
  0x11   :  { %p4352_p6 = por %p4351_p5, %p4350_p4 }
  0x13   :  { %p4353_p7 = pnand %p4352_p6, %p4346_p3 }
  0x15   :  { %4356 = shalt.err (!%p4353_p7)
}
  0x16   :  { %s4559_s25 = smov 128   ;;  %s4560_s26 = smov 8  }
  0x17   :  { %48 = dma.hbm_to_vmem [thread:$0]  %s5033_s2, 256, %s43_s14, [#allocation7], %s4559_s25, %s4559_s25, %s4560_s26  }
  0x18   :  { %s4357_s11 = scalar_lea.hbm %s5035_s4, 1024 }
  0x19   :  { %p4358_p8 = scmp.ne.s32.totalorder %s5035_s4, %s4357_s11  ;;  %p4361_p9 = scmp.lt.u32.totalorder %s4357_s11, %s5035_s4 }
  0x1b   :  { %p4363_p10 = pnand %p4361_p9, %p4358_p8 }
  0x1d   :  { %4366 = shalt.err (!%p4363_p10)
}
  0x1e   :  { %s4367_s18 = scalar_lea.vmem %s4633_s16, 1024  ;;  %p4372_p12 = scmp.lt.s32.totalorder %s4633_s16, %s4633_s16 }
  0x1f   :  { %p4368_p11 = scmp.ne.s32.totalorder %s4633_s16, %s4367_s18  ;;  %p4373_p13 = scmp.lt.s32.totalorder %s4367_s18, %s4367_s18 }
  0x21   :  { %p4374_p0 = por %p4373_p13, %p4372_p12 }
  0x23   :  { %p4375_p1 = pnand %p4374_p0, %p4368_p11 }
  0x25   :  { %4378 = shalt.err (!%p4375_p1)
}
  0x26   :  { %s4561_s2 = smov 64   ;;  %s4562_s14 = smov 4  }
  0x27   :  { %72 = dma.hbm_to_vmem [thread:$0]  %s5035_s4, 1024, %s4633_s16, [#allocation10], %s4561_s2, %s4561_s2, %s4562_s14  }
  0x28   :  { %s4563_s21 = smov [#allocation12]   ;;  %s4379_s27 = scalar_lea.hbm %s5037_s6, 16384 }
  0x29   :  { %s90_s22 = sshll.u32 %s4563_s21, 4  ;;  %p4380_p2 = scmp.ne.s32.totalorder %s5037_s6, %s4379_s27  ;;  %s91_s22 = int_to_ptr.vmem [resolvable:$true] %s90_s22 }
  0x2a   :  { %p4383_p3 = scmp.lt.u32.totalorder %s4379_s27, %s5037_s6 }
  0x2c   :  { %p4385_p4 = pnand %p4383_p3, %p4380_p2 }
  0x2e   :  { %4388 = shalt.err (!%p4385_p4)
}
  0x2f   :  { %s4389_s12 = scalar_lea.vmem %s91_s22, 16384  ;;  %p4394_p6 = scmp.lt.s32.totalorder %s91_s22, %s91_s22 }
  0x30   :  { %p4390_p5 = scmp.ne.s32.totalorder %s91_s22, %s4389_s12  ;;  %p4395_p7 = scmp.lt.s32.totalorder %s4389_s12, %s4389_s12 }
  0x32   :  { %p4396_p8 = por %p4395_p7, %p4394_p6 }
  0x34   :  { %p4397_p9 = pnand %p4396_p8, %p4390_p5 }
  0x36   :  { %4400 = shalt.err (!%p4397_p9)
}
  0x37   :  { %s4564_s4 = smov 256   ;;  %s4565_s16 = smov 16  }
  0x38   :  { %96 = dma.hbm_to_vmem [thread:$0]  %s5037_s6, 16384, %s91_s22, [#allocation13], %s4564_s4, %s4564_s4, %s4565_s16  }
  0x39   :  { %s4566_s17 = smov [#allocation2]   ;;  %s4567_s19 = smov [#allocation8]  }
  0x3a   :  { %s30_s18 = sshll.u32 %s4566_s17, 4  ;;  %s54_s20 = sshll.u32 %s4567_s19, 4  ;;  %s31_s18 = int_to_ptr.vmem [resolvable:$true] %s30_s18  ;;  %s55_s20 = int_to_ptr.vmem [resolvable:$true] %s54_s20 }
  0x3b   :  { %s4401_s24 = scalar_lea.hbm %s5032_s1, 256 }
  0x3c   :  { %p4402_p10 = scmp.ne.s32.totalorder %s5032_s1, %s4401_s24  ;;  %p4405_p11 = scmp.lt.u32.totalorder %s4401_s24, %s5032_s1 }
  0x3e   :  { %p4407_p12 = pnand %p4405_p11, %p4402_p10 }
  0x40   :  { %4410 = shalt.err (!%p4407_p12)
}
  0x41   :  { %s4411_s6 = scalar_lea.vmem %s31_s18, 256  ;;  %p4416_p0 = scmp.lt.s32.totalorder %s31_s18, %s31_s18 }
  0x42   :  { %p4412_p13 = scmp.ne.s32.totalorder %s31_s18, %s4411_s6  ;;  %p4417_p1 = scmp.lt.s32.totalorder %s4411_s6, %s4411_s6 }
  0x44   :  { %p4418_p2 = por %p4417_p1, %p4416_p0 }
  0x46   :  { %p4419_p3 = pnand %p4418_p2, %p4412_p13 }
  0x48   :  { %4422 = shalt.err (!%p4419_p3)
}
  0x49   :  { %36 = dma.hbm_to_vmem [thread:$0]  %s5032_s1, 256, %s31_s18, [#allocation3], %s4559_s25, %s4559_s25, %s4560_s26  }
  0x4a   :  { %s4423_s15 = scalar_lea.hbm %s5034_s3, 9216 }
  0x4b   :  { %p4424_p4 = scmp.ne.s32.totalorder %s5034_s3, %s4423_s15  ;;  %p4427_p5 = scmp.lt.u32.totalorder %s4423_s15, %s5034_s3 }
  0x4d   :  { %p4429_p6 = pnand %p4427_p5, %p4424_p4 }
  0x4f   :  { %4432 = shalt.err (!%p4429_p6)
}
  0x50   :  { %s4433_s24 = scalar_lea.vmem %s55_s20, 9216  ;;  %p4438_p8 = scmp.lt.s32.totalorder %s55_s20, %s55_s20 }
  0x51   :  { %p4434_p7 = scmp.ne.s32.totalorder %s55_s20, %s4433_s24  ;;  %p4439_p9 = scmp.lt.s32.totalorder %s4433_s24, %s4433_s24 }
  0x53   :  { %p4440_p10 = por %p4439_p9, %p4438_p8 }
  0x55   :  { %p4441_p11 = pnand %p4440_p10, %p4434_p7 }
  0x57   :  { %4444 = shalt.err (!%p4441_p11)
}
  0x58   :  { %s4568_s1 = smov 576   ;;  %s4569_s25 = smov 36  }
  0x59   :  { %60 = dma.hbm_to_vmem [thread:$0]  %s5034_s3, 9216, %s55_s20, [#allocation7], %s4568_s1, %s4568_s1, %s4569_s25  }
  0x5a   :  { %s4570_s27 = smov [#allocation11]   ;;  %s4571_s29 = smov [#allocation14]  }
  0x5b   :  { %s78_s28 = sshll.u32 %s4570_s27, 4  ;;  %s102_s30 = sshll.u32 %s4571_s29, 4  ;;  %s79_s28 = int_to_ptr.vmem [resolvable:$true] %s78_s28  ;;  %s103_s30 = int_to_ptr.vmem [resolvable:$true] %s102_s30 }
  0x5c   :  { %s4445_s11 = scalar_lea.hbm %s5036_s5, 1024 }
  0x5d   :  { %p4446_p12 = scmp.ne.s32.totalorder %s5036_s5, %s4445_s11  ;;  %p4449_p13 = scmp.lt.u32.totalorder %s4445_s11, %s5036_s5 }
  0x5f   :  { %p4451_p0 = pnand %p4449_p13, %p4446_p12 }
  0x61   :  { %4454 = shalt.err (!%p4451_p0)
}
  0x62   :  { %s4455_s3 = scalar_lea.vmem %s79_s28, 1024  ;;  %p4460_p2 = scmp.lt.s32.totalorder %s79_s28, %s79_s28 }
  0x63   :  { %p4456_p1 = scmp.ne.s32.totalorder %s79_s28, %s4455_s3  ;;  %p4461_p3 = scmp.lt.s32.totalorder %s4455_s3, %s4455_s3 }
  0x65   :  { %p4462_p4 = por %p4461_p3, %p4460_p2 }
  0x67   :  { %p4463_p5 = pnand %p4462_p4, %p4456_p1 }
  0x69   :  { %4466 = shalt.err (!%p4463_p5)
}
  0x6a   :  { %84 = dma.hbm_to_vmem [thread:$0]  %s5036_s5, 1024, %s79_s28, [#allocation10], %s4561_s2, %s4561_s2, %s4562_s14  }
  0x6b   :  { %s4467_s24 = scalar_lea.hbm %s5038_s7, 16384 }
  0x6c   :  { %p4468_p6 = scmp.ne.s32.totalorder %s5038_s7, %s4467_s24  ;;  %p4471_p7 = scmp.lt.u32.totalorder %s4467_s24, %s5038_s7 }
  0x6e   :  { %p4473_p8 = pnand %p4471_p7, %p4468_p6 }
  0x70   :  { %4476 = shalt.err (!%p4473_p8)
}
  0x71   :  { %s4477_s27 = scalar_lea.vmem %s103_s30, 16384  ;;  %p4482_p10 = scmp.lt.s32.totalorder %s103_s30, %s103_s30 }
  0x72   :  { %p4478_p9 = scmp.ne.s32.totalorder %s103_s30, %s4477_s27  ;;  %p4483_p11 = scmp.lt.s32.totalorder %s4477_s27, %s4477_s27 }
  0x74   :  { %p4484_p12 = por %p4483_p11, %p4482_p10 }
  0x76   :  { %p4485_p13 = pnand %p4484_p12, %p4478_p9 }
  0x78   :  { %4488 = shalt.err (!%p4485_p13)
}
  0x79   :  { %108 = dma.hbm_to_vmem [thread:$0]  %s5038_s7, 16384, %s103_s30, [#allocation13], %s4564_s4, %s4564_s4, %s4565_s16  }
  0x7a   :  { %s4572_s14 = smov [#allocation15]   ;;  %s4489_s22 = scalar_lea.hbm %s5039_s8, 240 }
  0x7b   :  { %s115_s28 = sshll.u32 %s4572_s14, 4  ;;  %p4490_p0 = scmp.ne.s32.totalorder %s5039_s8, %s4489_s22  ;;  %s116_s28 = int_to_ptr.vmem [resolvable:$true] %s115_s28 }
  0x7c   :  { %p4493_p1 = scmp.lt.u32.totalorder %s4489_s22, %s5039_s8 }
  0x7e   :  { %p4495_p2 = pnand %p4493_p1, %p4490_p0 }
  0x80   :  { %4498 = shalt.err (!%p4495_p2)
}
  0x81   :  { %s4499_s17 = scalar_lea.vmem %s116_s28, 240  ;;  %s4503_s7 = scalar_lea.vmem %s116_s28, 256 }
  0x82   :  { %p4500_p3 = scmp.ne.s32.totalorder %s116_s28, %s4499_s17  ;;  %p4504_p4 = scmp.lt.s32.totalorder %s116_s28, %s116_s28 }
  0x83   :  { %p4505_p5 = scmp.lt.s32.totalorder %s4503_s7, %s4499_s17 }
  0x85   :  { %p4506_p6 = por %p4505_p5, %p4504_p4 }
  0x87   :  { %p4507_p7 = pnand %p4506_p6, %p4500_p3 }
  0x89   :  { %4510 = shalt.err (!%p4507_p7)
}
  0x8a   :  { %118 = dma.hbm_to_vmem [thread:$0]  %s5039_s8, 240, %s116_s28, [#allocation16]  }
  0x8b   :  { %4543 = dma.done.wait [#allocation3], 256  }
  0x8c   :  { %4544 = vsyncadd [#allocation3], 4294967040 }
  0x8d   :  { %4545 = dma.done.wait [#allocation7], 9472  }
  0x8e   :  { %4546 = vsyncadd [#allocation7], 4294957824 }
  0x8f   :  { %4547 = dma.done.wait [#allocation10], 2048  }
  0x90   :  { %4548 = vsyncadd [#allocation10], 4294965248 }
  0x91   :  { %4549 = dma.done.wait [#allocation13], 32768  }
  0x92   :  { %4550 = vsyncadd [#allocation13], 4294934528 }
  0x93   :  { %4551 = dma.done.wait [#allocation16], 240  }
  0x94   :  { %4552 = vsyncadd [#allocation16], 4294967056  ;;  %v4573_v0 = vmov 0   ;;  %v3823_v1 = vld [vmem:[#allocation8 + $0x4] ss:$36 sps:$4 sm:$0xff]   ;;  %v149_v32 = vld [vmem:[%s5031_s0] sm:$0xff] }
  0x95   :  { %685 = vmatprep.mubr.bf16.mxu0 %v4573_v0  ;;  %744 = vmatprep.mubr.bf16.mxu1 %v4573_v0  ;;  %v3825_v2 = vld [vmem:[#allocation8] ss:$36 sps:$4 sm:$0xff]   ;;  %v3826_v3 = vld [vmem:[#allocation8 + $0xc] ss:$36 sps:$4 sm:$0xff]   ;;  %v3832_v7 = vld [vmem:[#allocation8 + $0x54] ss:$36 sps:$4 sm:$0xff]  }
  0x96   :  { %653 = vmatprep.subr.bf16.mxu0 %v3823_v1  ;;  %v3828_v4 = vld [vmem:[#allocation8 + $0x8] ss:$36 sps:$4 sm:$0xff]   ;;  %712 = vmatprep.subr.bf16.mxu1 %v3826_v3  ;;  %v3834_v8 = vld [vmem:[#allocation8 + $0x50] ss:$36 sps:$4 sm:$0xff]   ;;  %v3838_v11 = vld [vmem:[#allocation8 + $0x9c] ss:$36 sps:$4 sm:$0xff]  }
  0x97   :  { %654 = vmatpush1.bf16.msra.mxu0 %v3825_v2  ;;  %v3829_v5 = vld [vmem:[#allocation8 + $0x4c] ss:$36 sps:$4 sm:$0xff]   ;;  %713 = vmatpush1.bf16.msra.mxu1 %v3828_v4  ;;  %v3835_v9 = vld [vmem:[#allocation8 + $0x94] ss:$36 sps:$4 sm:$0xff]   ;;  %v3841_v12 = vld [vmem:[#allocation8 + $0xdc] ss:$36 sps:$4 sm:$0xff]  }
  0x98   :  { %v3831_v6 = vld [vmem:[#allocation8 + $0x48] ss:$36 sps:$4 sm:$0xff]   ;;  %655 = vmatprep.subr.bf16.mxu0 %v3829_v5  ;;  %714 = vmatprep.subr.bf16.mxu1 %v3832_v7  ;;  %v3837_v10 = vld [vmem:[#allocation8 + $0x90] ss:$36 sps:$4 sm:$0xff]   ;;  %v3840_v13 = vld [vmem:[#allocation8 + $0x98] ss:$36 sps:$4 sm:$0xff]  }
  0x99   :  { %v3844_v14 = vld [vmem:[#allocation8 + $0xe4] ss:$36 sps:$4 sm:$0xff]   ;;  %v3843_v15 = vld [vmem:[#allocation8 + $0xd8] ss:$36 sps:$4 sm:$0xff]   ;;  %v3850_v18 = vld [vmem:[#allocation8 + $0x12c] ss:$36 sps:$4 sm:$0xff]  }
  0x9a   :  { %v3847_v16 = vld [vmem:[#allocation8 + $0x124] ss:$36 sps:$4 sm:$0xff]   ;;  %v3853_v20 = vld [vmem:[#allocation8 + $0x16c] ss:$36 sps:$4 sm:$0xff]   ;;  %v3856_v22 = vld [vmem:[#allocation8 + $0x174] ss:$36 sps:$4 sm:$0xff]  }
  0x9b   :  { %656 = vmatpush1.bf16.msra.mxu0 %v3831_v6  ;;  %715 = vmatpush1.bf16.msra.mxu1 %v3834_v8  ;;  %v3846_v17 = vld [vmem:[#allocation8 + $0xe0] ss:$36 sps:$4 sm:$0xff]   ;;  %v3852_v21 = vld [vmem:[#allocation8 + $0x128] ss:$36 sps:$4 sm:$0xff]   ;;  %v3859_v24 = vld [vmem:[#allocation8 + $0x1b4] ss:$36 sps:$4 sm:$0xff]  }
  0x9c   :  { %657 = vmatprep.subr.bf16.mxu0 %v3835_v9  ;;  %716 = vmatprep.subr.bf16.mxu1 %v3838_v11  ;;  %v3849_v19 = vld [vmem:[#allocation8 + $0x120] ss:$36 sps:$4 sm:$0xff]   ;;  %v3855_v23 = vld [vmem:[#allocation8 + $0x168] ss:$36 sps:$4 sm:$0xff]   ;;  %v3858_v25 = vld [vmem:[#allocation8 + $0x170] ss:$36 sps:$4 sm:$0xff]  }
  0x9d   :  { %v3862_v26 = vld [vmem:[#allocation8 + $0x1bc] ss:$36 sps:$4 sm:$0xff]   ;;  %v3861_v27 = vld [vmem:[#allocation8 + $0x1b0] ss:$36 sps:$4 sm:$0xff]   ;;  %v3868_v30 = vld [vmem:[#allocation8 + $0x204] ss:$36 sps:$4 sm:$0xff]  }
  0x9e   :  { %v3865_v28 = vld [vmem:[#allocation8 + $0x1fc] ss:$36 sps:$4 sm:$0xff]   ;;  %v3873_v34 = vld [vmem:[#allocation8 + $0x14] ss:$36 sps:$4 sm:$0xff]   ;;  %v3882_v42 = vld [vmem:[#allocation8 + $0x64] ss:$36 sps:$4 sm:$0xff]  }
  0x9f   :  { %658 = vmatpush1.bf16.msra.mxu0 %v3837_v10  ;;  %717 = vmatpush1.bf16.msra.mxu1 %v3840_v13  ;;  %v3864_v29 = vld [vmem:[#allocation8 + $0x1b8] ss:$36 sps:$4 sm:$0xff]   ;;  %v3870_v35 = vld [vmem:[#allocation8 + $0x200] ss:$36 sps:$4 sm:$0xff]   ;;  %v3871_v38 = vld [vmem:[#allocation8 + $0x10] ss:$36 sps:$4 sm:$0xff]  }
  0xa0   :  { %659 = vmatprep.subr.bf16.mxu0 %v3841_v12  ;;  %718 = vmatprep.subr.bf16.mxu1 %v3844_v14  ;;  %v3867_v31 = vld [vmem:[#allocation8 + $0x1f8] ss:$36 sps:$4 sm:$0xff]   ;;  %v151_v43 = vld [vmem:[#allocation2] sm:$0xff]  ;;  %v152_v44 = vld [vmem:[#allocation2 + $0x8] sm:$0xff]  ;;  %v4574_v13 = vmov 0.0   ;;  %vm4575_vm0 = vmmov 0  }
  0xa1   :  { %v150_v33 = vld [vmem:[%s5031_s0 + $0x8] sm:$0xff]  ;;  %v3885_v45 = vld [vmem:[#allocation8 + $0xa4] ss:$36 sps:$4 sm:$0xff]   ;;  %v4768_v47 = vpack.c.bf16 %v152_v44, %v151_v43  ;;  %v3888_v48 = vld [vmem:[#allocation8 + $0xac] ss:$36 sps:$4 sm:$0xff]   ;;  %vm3131_vm1 = vcmask 7168  }
  0xa2   :  { %v4762_v36 = vpack.c.bf16 %v150_v33, %v149_v32  ;;  %v3876_v37 = vld [vmem:[#allocation8 + $0x1c] ss:$36 sps:$4 sm:$0xff]   ;;  %v3886_v50 = vld [vmem:[#allocation8 + $0xa8] ss:$36 sps:$4 sm:$0xff]   ;;  %v3894_v53 = vld [vmem:[#allocation8 + $0xf4] ss:$36 sps:$4 sm:$0xff]  }
  0xa3   :  { %660 = vmatpush1.bf16.msra.mxu0 %v3843_v15  ;;  %719 = vmatpush1.bf16.msra.mxu1 %v3846_v17  ;;  %v3879_v39 = vld [vmem:[#allocation8 + $0x5c] ss:$36 sps:$4 sm:$0xff]   ;;  %v3891_v51 = vld [vmem:[#allocation8 + $0xec] ss:$36 sps:$4 sm:$0xff]   ;;  %v3897_v57 = vld [vmem:[#allocation8 + $0x134] ss:$36 sps:$4 sm:$0xff]  }
  0xa4   :  { %661 = vmatprep.subr.bf16.mxu0 %v3847_v16  ;;  %720 = vmatprep.subr.bf16.mxu1 %v3850_v18  ;;  %v3874_v40 = vld [vmem:[#allocation8 + $0x18] ss:$36 sps:$4 sm:$0xff]   ;;  %v3880_v46 = vld [vmem:[#allocation8 + $0x60] ss:$36 sps:$4 sm:$0xff]   ;;  %v3889_v52 = vld [vmem:[#allocation8 + $0xe8] ss:$36 sps:$4 sm:$0xff]  }
  0xa5   :  { %v3877_v41 = vld [vmem:[#allocation8 + $0x58] ss:$36 sps:$4 sm:$0xff]   ;;  %v3883_v49 = vld [vmem:[#allocation8 + $0xa0] ss:$36 sps:$4 sm:$0xff]   ;;  %v153_v54 = vld [vmem:[#allocation6] sm:$0xff]  ;;  %s4576_s0 = smov [#allocation17]  }
  0xa6   :  { %v154_v55 = vld [vmem:[#allocation6 + $0x8] sm:$0xff]  ;;  %v3892_v56 = vld [vmem:[#allocation8 + $0xf0] ss:$36 sps:$4 sm:$0xff]   ;;  %v3906_v1 = vld [vmem:[#allocation8 + $0x184] ss:$36 sps:$4 sm:$0xff]   ;;  %s3293_s23 = sshll.u32 %s4576_s0, 4  ;;  %s3294_s23 = int_to_ptr.vmem [resolvable:$true] %s3293_s23 }
  0xa7   :  { %662 = vmatpush1.bf16.msra.mxu0 %v3849_v19  ;;  %721 = vmatpush1.bf16.msra.mxu1 %v3852_v21  ;;  %v3895_v58 = vld [vmem:[#allocation8 + $0x130] ss:$36 sps:$4 sm:$0xff]   ;;  %v3900_v59 = vld [vmem:[#allocation8 + $0x13c] ss:$36 sps:$4 sm:$0xff]   ;;  %v4774_v60 = vpack.c.bf16 %v154_v55, %v153_v54  ;;  %v3909_v3 = vld [vmem:[#allocation8 + $0x1c4] ss:$36 sps:$4 sm:$0xff]   ;;  %p4516_p9 = scmp.lt.s32.totalorder %s3294_s23, %s3294_s23 }
  0xa8   :  { %663 = vmatprep.subr.bf16.mxu0 %v3853_v20  ;;  %722 = vmatprep.subr.bf16.mxu1 %v3856_v22  ;;  %v3898_v61 = vld [vmem:[#allocation8 + $0x138] ss:$36 sps:$4 sm:$0xff]   ;;  %v3904_v2 = vld [vmem:[#allocation8 + $0x180] ss:$36 sps:$4 sm:$0xff]   ;;  %v3912_v5 = vld [vmem:[#allocation8 + $0x1cc] ss:$36 sps:$4 sm:$0xff]  }
  0xa9   :  { %v3903_v62 = vld [vmem:[#allocation8 + $0x17c] ss:$36 sps:$4 sm:$0xff]   ;;  %v3910_v6 = vld [vmem:[#allocation8 + $0x1c8] ss:$36 sps:$4 sm:$0xff]   ;;  %v3918_v9 = vld [vmem:[#allocation8 + $0x214] ss:$36 sps:$4 sm:$0xff]  }
  0xaa   :  { %v3901_v63 = vld [vmem:[#allocation8 + $0x178] ss:$36 sps:$4 sm:$0xff]   ;;  %v3907_v4 = vld [vmem:[#allocation8 + $0x1c0] ss:$36 sps:$4 sm:$0xff]   ;;  %v3915_v7 = vld [vmem:[#allocation8 + $0x20c] ss:$36 sps:$4 sm:$0xff]  }
  0xab   :  { %664 = vmatpush1.bf16.msra.mxu0 %v3855_v23  ;;  %723 = vmatpush1.bf16.msra.mxu1 %v3858_v25  ;;  %v3913_v8 = vld [vmem:[#allocation8 + $0x208] ss:$36 sps:$4 sm:$0xff]   ;;  %v3916_v10 = vld [vmem:[#allocation8 + $0x210] ss:$36 sps:$4 sm:$0xff]   ;;  %v3927_v11 = vld [vmem:[#allocation9] sm:$0xff]   ;;  %s4511_s24 = scalar_lea.vmem %s3294_s23, 512 }
  0xac   :  { %665 = vmatprep.subr.bf16.mxu0 %v3859_v24  ;;  %724 = vmatprep.subr.bf16.mxu1 %v3862_v26  ;;  %v3919_v12 = vld [vmem:[#allocation8 + $0x20] ss:$36 sps:$4 sm:$0xff]   ;;  %v3928_v14 = vld [vmem:[#allocation9 + $0x8] sm:$0xff]   ;;  %v3929_v16 = vld [vmem:[#allocation9 + $0x10] sm:$0xff]   ;;  %p4512_p8 = scmp.ne.s32.totalorder %s3294_s23, %s4511_s24  ;;  %p4517_p10 = scmp.lt.s32.totalorder %s4511_s24, %s4511_s24 }
  0xad   :  { %v3920_v15 = vld [vmem:[#allocation8 + $0x68] ss:$36 sps:$4 sm:$0xff]   ;;  %v3921_v17 = vld [vmem:[#allocation8 + $0xb0] ss:$36 sps:$4 sm:$0xff]   ;;  %v3930_v18 = vld [vmem:[#allocation9 + $0x18] sm:$0xff]  }
  0xae   :  { %v3922_v19 = vld [vmem:[#allocation8 + $0xf8] ss:$36 sps:$4 sm:$0xff]   ;;  %v3931_v20 = vld [vmem:[#allocation9 + $0x20] sm:$0xff]   ;;  %v3924_v22 = vld [vmem:[#allocation8 + $0x188] ss:$36 sps:$4 sm:$0xff]   ;;  %p4518_p11 = por %p4517_p10, %p4516_p9 }
  0xaf   :  { %666 = vmatpush1.bf16.msra.mxu0 %v3861_v27  ;;  %725 = vmatpush1.bf16.msra.mxu1 %v3864_v29  ;;  %v3923_v21 = vld [vmem:[#allocation8 + $0x140] ss:$36 sps:$4 sm:$0xff]   ;;  %v3925_v23 = vld [vmem:[#allocation8 + $0x1d0] ss:$36 sps:$4 sm:$0xff]   ;;  %v3932_v24 = vld [vmem:[#allocation9 + $0x28] sm:$0xff]  }
  0xb0   :  { %667 = vmatprep.subr.bf16.mxu0 %v3865_v28  ;;  %726 = vmatprep.subr.bf16.mxu1 %v3868_v30  ;;  %v3933_v25 = vld [vmem:[#allocation9 + $0x30] sm:$0xff]   ;;  %v3934_v26 = vld [vmem:[#allocation9 + $0x38] sm:$0xff]   ;;  %v240_v28 = vlaneseq  ;;  %p4519_p12 = pnand %p4518_p11, %p4512_p8 }
  0xb1   :  { %v3937_v27 = vld [vmem:[#allocation14 + $0x4] ss:$16 sps:$4 sm:$0xff]  }
  0xb2   :  { %v4793_v29 = vshrl.u32 %v240_v28, 7 }
  0xb3   :  { %668 = vmatpush1.bf16.msra.mxu0 %v3867_v31  ;;  %727 = vmatpush1.bf16.msra.mxu1 %v3870_v35  ;;  %v4796_v31 = vld [vmem:[#allocation15] sm:$0xff] }
  0xb4   :  { %771 = vmatprep.subr.bf16.mxu0 %v3873_v34  ;;  %828 = vmatprep.subr.bf16.mxu1 %v3876_v37  ;;  %v242_v30 = vsub.s32 0, %v4793_v29  ;;  %v246_v32 = vsub.s32 1, %v4793_v29  ;;  %v250_v33 = vsub.s32 2, %v4793_v29  ;;  %v254_v34 = vsub.s32 3, %v4793_v29 }
  0xb6   :  { %686 = vmatmul.mubr.bf16.vlgmr.msra.gmra.mrb[0].mxu0 %v4762_v36  ;;  %745 = vmatmul.mubr.bf16.vlgmr.msra.gmra.mrb[0].mxu1 %v4762_v36  ;;  %v243_v35 = vrot.slane %v4796_v31, %v242_v30  ;;  %v251_v37 = vrot.slane %v4796_v31, %v250_v33 }
  0xb7   :  { %772 = vmatpush1.bf16.msra.mxu0 %v3871_v38  ;;  %695 = vmatprep.mubr.bf16.mxu0 %v4573_v0 }
  0xb8   :  { %773 = vmatprep.subr.bf16.mxu0 %v3879_v39  ;;  %829 = vmatpush1.bf16.msra.mxu1 %v3874_v40  ;;  %v255_v39 = vrot.slane %v4796_v31, %v254_v34 }
  0xb9   :  { %754 = vmatprep.mubr.bf16.mxu1 %v4573_v0  ;;  %830 = vmatprep.subr.bf16.mxu1 %v3882_v42 }
  0xbb   :  { %774 = vmatpush1.bf16.msra.mxu0 %v3877_v41 }
  0xbc   :  { %775 = vmatprep.subr.bf16.mxu0 %v3885_v45  ;;  %831 = vmatpush1.bf16.msra.mxu1 %v3880_v46 }
  0xbd   :  { %832 = vmatprep.subr.bf16.mxu1 %v3888_v48 }
  0xbe   :  { %696 = vmatmul.mubr.bf16.gmra.mrb[4].mxu0 %v4768_v47  ;;  %755 = vmatmul.mubr.bf16.gmra.mrb[4].mxu1 %v4768_v47 }
  0xbf   :  { %776 = vmatpush1.bf16.msra.mxu0 %v3883_v49  ;;  %705 = vmatprep.mubr.bf16.mxu0 %v4573_v0 }
  0xc0   :  { %777 = vmatprep.subr.bf16.mxu0 %v3891_v51  ;;  %833 = vmatpush1.bf16.msra.mxu1 %v3886_v50 }
  0xc1   :  { %764 = vmatprep.mubr.bf16.mxu1 %v4573_v0  ;;  %834 = vmatprep.subr.bf16.mxu1 %v3894_v53 }
  0xc3   :  { %778 = vmatpush1.bf16.msra.mxu0 %v3889_v52 }
  0xc4   :  { %779 = vmatprep.subr.bf16.mxu0 %v3897_v57  ;;  %835 = vmatpush1.bf16.msra.mxu1 %v3892_v56 }
  0xc5   :  { %836 = vmatprep.subr.bf16.mxu1 %v3900_v59 }
  0xc6   :  { %706 = vmatmul.mubr.bf16.gmra.mrb[8].mxu0 %v4774_v60  ;;  %765 = vmatmul.mubr.bf16.gmra.mrb[8].mxu1 %v4774_v60 }
  0xc7   :  { %780 = vmatpush1.bf16.msra.mxu0 %v3895_v58  ;;  %803 = vmatprep.mubr.bf16.mxu0 %v4573_v0 }
  0xc8   :  { %781 = vmatprep.subr.bf16.mxu0 %v3903_v62  ;;  %837 = vmatpush1.bf16.msra.mxu1 %v3898_v61 }
  0xc9   :  { %860 = vmatprep.mubr.bf16.mxu1 %v4573_v0  ;;  %838 = vmatprep.subr.bf16.mxu1 %v3906_v1 }
  0xcb   :  { %782 = vmatpush1.bf16.msra.mxu0 %v3901_v63 }
  0xcc   :  { %783 = vmatprep.subr.bf16.mxu0 %v3909_v3  ;;  %839 = vmatpush1.bf16.msra.mxu1 %v3904_v2 }
  0xcd   :  { %840 = vmatprep.subr.bf16.mxu1 %v3912_v5 }
  0xcf   :  { %784 = vmatpush1.bf16.msra.mxu0 %v3907_v4 }
  0xd0   :  { %785 = vmatprep.subr.bf16.mxu0 %v3915_v7  ;;  %841 = vmatpush1.bf16.msra.mxu1 %v3910_v6 }
  0xd1   :  { %842 = vmatprep.subr.bf16.mxu1 %v3918_v9 }
  0xd3   :  { %786 = vmatpush1.bf16.msra.mxu0 %v3913_v8 }
  0xd4   :  { %3700 = vmatprep.subr.bf16.mxu0 %v4574_v13  ;;  %843 = vmatpush1.bf16.msra.mxu1 %v3916_v10  ;;  %v3935_v10 = vld [vmem:[#allocation14] ss:$16 sps:$4 sm:$0xff]  }
  0xd5   :  { %3728 = vmatprep.subr.bf16.mxu1 %v3927_v11 }
  0xd6   :  { %804 = vmatmul.mubr.bf16.vlgmr.msra.gmra.mrb[12].mxu0 %v4762_v36 }
  0xd7   :  { %3701 = vmatpush3.bf16.msra.mxu0 %v3919_v12  ;;  %811 = vmatprep.mubr.bf16.mxu0 %v4573_v0 }
  0xd8   :  { %861 = vmatmul.mubr.bf16.vlgmr.msra.gmra.mrb[12].mxu1 %v4762_v36  ;;  %3702 = vmatprep.subr.bf16.mxu0 %v4574_v13 }
  0xd9   :  { %866 = vmatprep.mubr.bf16.mxu1 %v4573_v0  ;;  %3729 = vmatpush3.bf16.msra.mxu1 %v3927_v11 }
  0xda   :  { %3730 = vmatprep.subr.bf16.mxu1 %v3928_v14 }
  0xdb   :  { %3703 = vmatpush3.bf16.msra.mxu0 %v3920_v15 }
  0xdc   :  { %3704 = vmatprep.subr.bf16.mxu0 %v4574_v13 }
  0xdd   :  { %3731 = vmatpush3.bf16.msra.mxu1 %v3928_v14 }
  0xde   :  { %812 = vmatmul.mubr.bf16.gmra.mrb[16].mxu0 %v4768_v47  ;;  %3732 = vmatprep.subr.bf16.mxu1 %v3929_v16 }
  0xdf   :  { %3705 = vmatpush3.bf16.msra.mxu0 %v3921_v17  ;;  %819 = vmatprep.mubr.bf16.mxu0 %v4573_v0 }
  0xe0   :  { %867 = vmatmul.mubr.bf16.gmra.mrb[16].mxu1 %v4768_v47  ;;  %3706 = vmatprep.subr.bf16.mxu0 %v4574_v13 }
  0xe1   :  { %872 = vmatprep.mubr.bf16.mxu1 %v4573_v0  ;;  %3733 = vmatpush3.bf16.msra.mxu1 %v3929_v16  ;;  %v3926_v0 = vld [vmem:[#allocation8 + $0x218] ss:$36 sps:$4 sm:$0xff]  }
  0xe2   :  { %3734 = vmatprep.subr.bf16.mxu1 %v3930_v18 }
  0xe3   :  { %3707 = vmatpush3.bf16.msra.mxu0 %v3922_v19 }
  0xe4   :  { %3708 = vmatprep.subr.bf16.mxu0 %v4574_v13 }
  0xe5   :  { %3735 = vmatpush3.bf16.msra.mxu1 %v3930_v18 }
  0xe6   :  { %820 = vmatmul.mubr.bf16.gmra.mrb[20].mxu0 %v4774_v60  ;;  %3736 = vmatprep.subr.bf16.mxu1 %v3931_v20 }
  0xe7   :  { %3709 = vmatpush3.bf16.msra.mxu0 %v3923_v21  ;;  %3716 = vmatprep.mubr.msk.bf16.mxu0 %vm4575_vm0, %v4574_v13 }
  0xe8   :  { %873 = vmatmul.mubr.bf16.gmra.mrb[20].mxu1 %v4774_v60  ;;  %3710 = vmatprep.subr.bf16.mxu0 %v4574_v13 }
  0xe9   :  { %3737 = vmatpush3.bf16.msra.mxu1 %v3931_v20 }
  0xea   :  { %3738 = vmatprep.subr.bf16.mxu1 %v3932_v24 }
  0xeb   :  { %3711 = vmatpush3.bf16.msra.mxu0 %v3924_v22 }
  0xec   :  { %3712 = vmatprep.subr.bf16.mxu0 %v4574_v13 }
  0xed   :  { %3739 = vmatpush3.bf16.msra.mxu1 %v3932_v24 }
  0xee   :  { %3740 = vmatprep.subr.bf16.mxu1 %v3933_v25 }
  0xef   :  { %3713 = vmatpush3.bf16.msra.mxu0 %v3925_v23  ;;  %v3938_v23 = vld [vmem:[#allocation14 + $0x20] ss:$16 sps:$4 sm:$0xff]  }
  0xf0   :  { %3714 = vmatprep.subr.bf16.mxu0 %v4574_v13 }
  0xf1   :  { %3741 = vmatpush3.bf16.msra.mxu1 %v3933_v25  ;;  %v3943_v25 = vld [vmem:[#allocation14 + $0x44] ss:$16 sps:$4 sm:$0xff]  }
  0xf2   :  { %3742 = vmatprep.subr.bf16.mxu1 %v3934_v26 }
  0xf3   :  { %3715 = vmatpush3.bf16.msra.mxu0 %v3926_v0 }
  0xf5   :  { %3743 = vmatpush3.bf16.msra.mxu1 %v3934_v26 }
  0xf6   :  { %3717 = vmatmul.mubr.bf16.vlgmr.msra.gmra.mrb[24].mxu0 %v4762_v36  ;;  %2086 = vmatprep.subr.bf16.mxu1 %v3937_v27  ;;  %v247_v36 = vrot.slane %v4796_v31, %v246_v32 }
  0xf7   :  { %3720 = vmatprep.mubr.msk.bf16.mxu0 %vm4575_vm0, %v4574_v13 }
  0xfe   :  { %3721 = vmatmul.mubr.bf16.gmra.mrb[28].mxu0 %v4768_v47 }
  0xff   :  { %3724 = vmatprep.mubr.msk.bf16.mxu0 %vm4575_vm0, %v4574_v13  ;;  %v3940_v13 = vld [vmem:[#allocation14 + $0x24] ss:$16 sps:$4 sm:$0xff]  }
 0x106   :  { %3725 = vmatmul.mubr.bf16.gmra.mrb[32].mxu0 %v4774_v60 }
 0x189   :  { %v687_v38 = vpop.f32.mrb[0].mxu0  ;;  %v746_v44 = vpop.f32.mrb[0].mxu1 }
 0x18a   :  { %v4813_v40 = vadd.f32 %v687_v38, %v243_v35  ;;  %v689_v41 = vpop.f32.mrb[1].mxu0  ;;  %v4820_v47 = vadd.f32 %v746_v44, %v251_v37  ;;  %v748_v48 = vpop.f32.mrb[1].mxu1 }
 0x18b   :  { %v4815_v42 = vadd.f32 %v689_v41, %v247_v36  ;;  %v691_v43 = vpop.f32.mrb[2].mxu0  ;;  %v4824_v50 = vadd.f32 %v748_v48, %v255_v39  ;;  %v750_v51 = vpop.f32.mrb[2].mxu1 }
 0x18c   :  { %3284 = vst [vmem:[#allocation17] sm:$0xff] %v4813_v40  ;;  %v4818_v45 = vadd.f32 %v691_v43, %v243_v35  ;;  %v693_v46 = vpop.f32.mrb[3].mxu0  ;;  %v4831_v54 = vadd.f32 %v750_v51, %v251_v37  ;;  %v752_v55 = vpop.f32.mrb[3].mxu1  ;;  %v3946_v43 = vld [vmem:[#allocation14 + $0x64] ss:$16 sps:$4 sm:$0xff]  }
 0x18d   :  { %v4822_v49 = vadd.f32 %v693_v46, %v247_v36  ;;  %v4837_v57 = vadd.f32 %v752_v55, %v255_v39  ;;  %v3949_v55 = vld [vmem:[#allocation14 + $0x84] ss:$16 sps:$4 sm:$0xff]  }
 0x18e   :  { %v3252_v52 = vadd.f32 %v4818_v45, %v4813_v40  ;;  %3285 = vst [vmem:[#allocation17 + $0x10] sm:$0xff] %v4818_v45  ;;  %v936_v53 = vpack.c.bf16 %v4818_v45, %v4813_v40  ;;  %v4841_v59 = vpack.c.bf16 %v4831_v54, %v4820_v47 }
 0x18f   :  { %v4835_v56 = vpack.c.bf16 %v4822_v49, %v4815_v42  ;;  %v4845_v61 = vpack.c.bf16 %v4837_v57, %v4824_v50 }
 0x190   :  { %v3253_v58 = vrot.slane %v3252_v52, 4  ;;  %3744 = vmatprep.mubr.bf16.mxu1 %v936_v53  ;;  %v3944_v53 = vld [vmem:[#allocation14 + $0x60] ss:$16 sps:$4 sm:$0xff]  }
 0x191   :  { %v697_v60 = vpop.f32.mrb[4].mxu0  ;;  %v756_v3 = vpop.f32.mrb[4].mxu1 }
 0x192   :  { %v698_v62 = vadd.f32 %v697_v60, %v243_v35  ;;  %v699_v63 = vpop.f32.mrb[5].mxu0  ;;  %v3254_v1 = vadd.f32 %v3253_v58, %v3252_v52  ;;  %v758_v6 = vpop.f32.mrb[5].mxu1  ;;  %v4851_v14 = vadd.f32 %v756_v3, %v251_v37  ;;  %v258_v58 = vsub.s32 4, %v4793_v29 }
 0x193   :  { %v701_v2 = vpop.f32.mrb[6].mxu0  ;;  %v4847_v8 = vadd.f32 %v699_v63, %v247_v36  ;;  %v760_v11 = vpop.f32.mrb[6].mxu1  ;;  %v4859_v19 = vadd.f32 %v758_v6, %v255_v39  ;;  %v3952_v63 = vld [vmem:[#allocation14 + $0xa4] ss:$16 sps:$4 sm:$0xff]  }
 0x194   :  { %3286 = vst [vmem:[#allocation17 + $0x8] sm:$0xff] %v698_v62  ;;  %v702_v4 = vadd.f32 %v701_v2, %v243_v35  ;;  %v703_v5 = vpop.f32.mrb[7].mxu0  ;;  %v3255_v7 = vrot.slane %v3254_v1, 2  ;;  %v4853_v15 = vadd.f32 %v760_v11, %v251_v37  ;;  %v762_v16 = vpop.f32.mrb[7].mxu1 }
 0x195   :  { %v4849_v9 = vadd.f32 %v703_v5, %v247_v36  ;;  %v4861_v20 = vadd.f32 %v762_v16, %v255_v39  ;;  %v3941_v39 = vld [vmem:[#allocation14 + $0x40] ss:$16 sps:$4 sm:$0xff]  }
 0x196   :  { %v937_v12 = vpack.c.bf16 %v702_v4, %v698_v62  ;;  %3287 = vst [vmem:[#allocation17 + $0x18] sm:$0xff] %v702_v4  ;;  %v3256_v17 = vadd.f32 %v3255_v7, %v3254_v1  ;;  %v4865_v21 = vpack.c.bf16 %v4853_v15, %v4851_v14  ;;  %v3947_v62 = vld [vmem:[#allocation14 + $0x80] ss:$16 sps:$4 sm:$0xff]   ;;  %v259_v1 = vrot.slane %v4796_v31, %v258_v58 }
 0x197   :  { %v4857_v18 = vpack.c.bf16 %v4849_v9, %v4847_v8  ;;  %v4869_v24 = vpack.c.bf16 %v4861_v20, %v4859_v19 }
 0x198   :  { %3745 = vmatmul.mubr.bf16.vlgmr.msra.gmra.mrb[24].mxu1 %v937_v12  ;;  %v3257_v22 = vrot.slane %v3256_v17, 1  ;;  %v3953_v12 = vld [vmem:[#allocation14 + $0xc0] ss:$16 sps:$4 sm:$0xff]  }
 0x199   :  { %2087 = vmatpush1.bf16.msra.mxu1 %v3935_v10  ;;  %v707_v0 = vpop.f32.mrb[8].mxu0  ;;  %2118 = vmatprep.mubr.bf16.mxu1 %v4865_v21  ;;  %v766_v28 = vpop.f32.mrb[8].mxu1 }
 0x19a   :  { %2088 = vmatprep.subr.bf16.mxu1 %v3940_v13  ;;  %v708_v26 = vpop.f32.mrb[9].mxu0  ;;  %v3258_v27 = vadd.f32 %v3257_v22, %v3256_v17  ;;  %v767_v36 = vpop.f32.mrb[9].mxu1  ;;  %v3958_v17 = vld [vmem:[#allocation14 + $0xe4] ss:$16 sps:$4 sm:$0xff]  }
 0x19b   :  { %v709_v35 = vpop.f32.mrb[10].mxu0  ;;  %v768_v41 = vpop.f32.mrb[10].mxu1  ;;  %v3961_v26 = vld [vmem:[#allocation14 + $0x104] ss:$16 sps:$4 sm:$0xff]  }
 0x19c   :  { %v710_v37 = vpop.f32.mrb[11].mxu0  ;;  %v3260_v38 = vmul.f32 0.0625, %v3258_v27  ;;  %v769_v44 = vpop.f32.mrb[11].mxu1  ;;  %v262_v35 = vsub.s32 5, %v4793_v29  ;;  %v266_v41 = vsub.s32 6, %v4793_v29 }
 0x19d   :  { %2089 = vmatpush1.bf16.msra.mxu1 %v3938_v23  ;;  %v3956_v23 = vld [vmem:[#allocation14 + $0xe0] ss:$16 sps:$4 sm:$0xff]  }
 0x19e   :  { %2090 = vmatprep.subr.bf16.mxu1 %v3943_v25  ;;  %v3261_v46 = vsub.f32 %v4813_v40, %v3260_v38  ;;  %v3262_v48 = vsub.f32 %v4818_v45, %v3260_v38  ;;  %v3950_v40 = vld [vmem:[#allocation14 + $0xa0] ss:$16 sps:$4 sm:$0xff]   ;;  %v3955_v45 = vld [vmem:[#allocation14 + $0xc4] ss:$16 sps:$4 sm:$0xff]  }
 0x1a0   :  { %v3263_v51 = vmul.f32 %v3261_v46, %v3261_v46  ;;  %v3264_v52 = vmul.f32 %v3262_v48, %v3262_v48  ;;  %v270_v46 = vsub.s32 7, %v4793_v29 }
 0x1a1   :  { %2091 = vmatpush1.bf16.msra.mxu1 %v3941_v39 }
 0x1a2   :  { %2092 = vmatprep.subr.bf16.mxu1 %v3946_v43  ;;  %v4875_v60 = vadd.f32 %v3264_v52, %v3263_v51  ;;  %v3959_v43 = vld [vmem:[#allocation14 + $0x100] ss:$16 sps:$4 sm:$0xff]   ;;  %v3964_v52 = vld [vmem:[#allocation14 + $0x124] ss:$16 sps:$4 sm:$0xff]  }
 0x1a5   :  { %2093 = vmatpush1.bf16.msra.mxu1 %v3944_v53  ;;  %v4898_v53 = vrot.slane %v4796_v31, %v262_v35 }
 0x1a6   :  { %2094 = vmatprep.subr.bf16.mxu1 %v3949_v55  ;;  %v4901_v55 = vrot.slane %v4796_v31, %v266_v41 }
 0x1a9   :  { %2095 = vmatpush1.bf16.msra.mxu1 %v3947_v62  ;;  %v805_v2 = vpop.f32.mrb[12].mxu0  ;;  %v3962_v62 = vld [vmem:[#allocation14 + $0x120] ss:$16 sps:$4 sm:$0xff]  }
 0x1aa   :  { %2096 = vmatprep.subr.bf16.mxu1 %v3952_v63  ;;  %v4878_v3 = vadd.f32 %v805_v2, %v259_v1  ;;  %v807_v4 = vpop.f32.mrb[13].mxu0  ;;  %v4904_v63 = vrot.slane %v4796_v31, %v270_v46 }
 0x1ab   :  { %v862_v5 = vpop.f32.mrb[12].mxu1  ;;  %v808_v6 = vpop.f32.mrb[14].mxu0 }
 0x1ac   :  { %v4880_v7 = vadd.f32 %v808_v6, %v259_v1  ;;  %v863_v10 = vpop.f32.mrb[13].mxu1  ;;  %v810_v11 = vpop.f32.mrb[15].mxu0 }
 0x1ad   :  { %2097 = vmatpush1.bf16.msra.mxu1 %v3950_v40  ;;  %v864_v13 = vpop.f32.mrb[14].mxu1  ;;  %v3967_v40 = vld [vmem:[#allocation14 + $0x144] ss:$16 sps:$4 sm:$0xff]  }
 0x1ae   :  { %2098 = vmatprep.subr.bf16.mxu1 %v3955_v45  ;;  %v4884_v16 = vpack.c.bf16 %v4880_v7, %v4878_v3  ;;  %v865_v22 = vpop.f32.mrb[15].mxu1  ;;  %v3965_v13 = vld [vmem:[#allocation14 + $0x140] ss:$16 sps:$4 sm:$0xff]  }
 0x1b1   :  { %2099 = vmatpush1.bf16.msra.mxu1 %v3953_v12  ;;  %v813_v0 = vpop.f32.mrb[16].mxu0 }
 0x1b2   :  { %2100 = vmatprep.subr.bf16.mxu1 %v3958_v17  ;;  %v815_v25 = vpop.f32.mrb[17].mxu0  ;;  %v4887_v36 = vadd.f32 %v813_v0, %v259_v1  ;;  %v3970_v0 = vld [vmem:[#allocation14 + $0x164] ss:$16 sps:$4 sm:$0xff]  }
 0x1b3   :  { %v868_v27 = vpop.f32.mrb[16].mxu1  ;;  %v816_v28 = vpop.f32.mrb[18].mxu0 }
 0x1b4   :  { %v4889_v37 = vadd.f32 %v816_v28, %v259_v1  ;;  %v869_v38 = vpop.f32.mrb[17].mxu1  ;;  %v818_v39 = vpop.f32.mrb[19].mxu0 }
 0x1b5   :  { %2101 = vmatpush1.bf16.msra.mxu1 %v3956_v23  ;;  %v870_v44 = vpop.f32.mrb[18].mxu1  ;;  %v3968_v38 = vld [vmem:[#allocation14 + $0x160] ss:$16 sps:$4 sm:$0xff]  }
 0x1b6   :  { %v4895_v48 = vpack.c.bf16 %v4889_v37, %v4887_v36  ;;  %2102 = vmatprep.subr.bf16.mxu1 %v3961_v26  ;;  %v871_v51 = vpop.f32.mrb[19].mxu1 }
 0x1b7   :  { %v3971_v51 = vld [vmem:[#allocation14 + $0x180] ss:$16 sps:$4 sm:$0xff]  }
 0x1b9   :  { %2103 = vmatpush1.bf16.msra.mxu1 %v3959_v43  ;;  %v821_v58 = vpop.f32.mrb[20].mxu0 }
 0x1ba   :  { %v822_v1 = vpop.f32.mrb[21].mxu0  ;;  %2104 = vmatprep.subr.bf16.mxu1 %v3964_v52  ;;  %v3976_v52 = vld [vmem:[#allocation14 + $0x1a4] ss:$16 sps:$4 sm:$0xff]  }
 0x1bb   :  { %v4907_v2 = vadd.f32 %v822_v1, %v4898_v53  ;;  %v874_v45 = vpop.f32.mrb[20].mxu1  ;;  %v824_v4 = vpop.f32.mrb[22].mxu0 }
 0x1bc   :  { %v4910_v5 = vadd.f32 %v874_v45, %v4901_v55  ;;  %v825_v6 = vpop.f32.mrb[23].mxu0  ;;  %v876_v10 = vpop.f32.mrb[21].mxu1  ;;  %v3977_v45 = vld [vmem:[#allocation14 + $0x1c0] ss:$16 sps:$4 sm:$0xff]   ;;  %v3982_v4 = vld [vmem:[#allocation14 + $0x1e4] ss:$16 sps:$4 sm:$0xff]  }
 0x1bd   :  { %v3147_v11 = vsub.f32 %v4815_v42, %v4907_v2  ;;  %v3155_v31 = vsub.f32 %v4847_v8, %v4907_v2  ;;  %v4917_v12 = vadd.f32 %v876_v10, %v4904_v63  ;;  %2105 = vmatpush1.bf16.msra.mxu1 %v3962_v62  ;;  %v878_v17 = vpop.f32.mrb[22].mxu1  ;;  %v3980_v10 = vld [vmem:[#allocation14 + $0x1e0] ss:$16 sps:$4 sm:$0xff]  }
 0x1be   :  { %v3148_v22 = vsub.f32 %v4820_v47, %v4910_v5  ;;  %v3156_v23 = vsub.f32 %v4851_v14, %v4910_v5  ;;  %2106 = vmatprep.subr.bf16.mxu1 %v3967_v40  ;;  %v880_v25 = vpop.f32.mrb[23].mxu1  ;;  %v3973_v14 = vld [vmem:[#allocation14 + $0x184] ss:$16 sps:$4 sm:$0xff]  }
 0x1bf   :  { %v3171_v26 = vmul.f32 %v3147_v11, %v3147_v11  ;;  %v3198_v42 = vmul.f32 %v3155_v31, %v3155_v31  ;;  %v3149_v8 = vsub.f32 %v4824_v50, %v4917_v12  ;;  %v3157_v35 = vsub.f32 %v4859_v19, %v4917_v12  ;;  %v3974_v50 = vld [vmem:[#allocation14 + $0x1a0] ss:$16 sps:$4 sm:$0xff]   ;;  %v3979_v19 = vld [vmem:[#allocation14 + $0x1c4] ss:$16 sps:$4 sm:$0xff]  }
 0x1c0   :  { %v3172_v27 = vmul.f32 %v3148_v22, %v3148_v22  ;;  %v3199_v28 = vmul.f32 %v3156_v23, %v3156_v23 }
 0x1c1   :  { %2107 = vmatpush1.bf16.msra.mxu1 %v3965_v13  ;;  %v3173_v41 = vmul.f32 %v3149_v8, %v3149_v8  ;;  %v3200_v43 = vmul.f32 %v3157_v35, %v3157_v35  ;;  %v3985_v13 = vld [vmem:[#allocation14 + $0x204] ss:$16 sps:$4 sm:$0xff]   ;;  %v4935_v8 = vadd.f32 %v878_v17, %v4901_v55  ;;  %v4083_v35 = vld [vmem:[#allocation11 + $0x8] sm:$0xff]  }
 0x1c2   :  { %v3179_v39 = vadd.f32 %v3172_v27, %v3171_v26  ;;  %v3206_v47 = vadd.f32 %v3199_v28, %v3198_v42  ;;  %2108 = vmatprep.subr.bf16.mxu1 %v3970_v0  ;;  %v4079_v0 = vld [vmem:[#allocation11] sm:$0xff]   ;;  %v4932_v27 = vadd.f32 %v825_v6, %v4898_v53  ;;  %v3322_v28 = vld [vmem:[#allocation15 + $0x8] ss:$0 sm:$0xff] }
 0x1c3   :  { %v3983_v26 = vld [vmem:[#allocation14 + $0x200] ss:$16 sps:$4 sm:$0xff]   ;;  %v3988_v42 = vld [vmem:[#allocation14 + $0x224] ss:$16 sps:$4 sm:$0xff]   ;;  %3748 = vmatprep.subr.bf16.mxu0 %v4079_v0 }
 0x1c4   :  { %v4927_v44 = vadd.f32 %v3179_v39, %v3173_v41  ;;  %v4929_v46 = vadd.f32 %v3206_v47, %v3200_v43  ;;  %3749 = vmatpush3.bf16.msra.mxu0 %v4079_v0  ;;  %v3986_v39 = vld [vmem:[#allocation14 + $0x220] ss:$16 sps:$4 sm:$0xff]   ;;  %v4939_v47 = vadd.f32 %v880_v25, %v4904_v63  ;;  %v3991_v53 = vld [vmem:[#allocation14 + $0x244] ss:$16 sps:$4 sm:$0xff]   ;;  %v3151_v55 = vsub.f32 %v4822_v49, %v4932_v27 }
 0x1c5   :  { %2109 = vmatpush1.bf16.msra.mxu1 %v3968_v38  ;;  %3750 = vmatprep.subr.bf16.mxu0 %v4083_v35  ;;  %v3159_v17 = vsub.f32 %v4849_v9, %v4932_v27  ;;  %v3152_v43 = vsub.f32 %v4831_v54, %v4935_v8  ;;  %v3160_v63 = vsub.f32 %v4853_v15, %v4935_v8  ;;  %v4087_v49 = vld [vmem:[#allocation11 + $0x10] sm:$0xff]  }
 0x1c6   :  { %2110 = vmatprep.subr.bf16.mxu1 %v3973_v14  ;;  %v3153_v9 = vsub.f32 %v4837_v57, %v4939_v47  ;;  %v3989_v54 = vld [vmem:[#allocation14 + $0x240] ss:$16 sps:$4 sm:$0xff]   ;;  %v3161_v15 = vsub.f32 %v4861_v20, %v4939_v47 }
 0x1c7   :  { %v3992_v20 = vld [vmem:[#allocation14 + $0x260] ss:$16 sps:$4 sm:$0xff]  }
 0x1c8   :  { %3751 = vmatpush3.bf16.msra.mxu0 %v4083_v35  ;;  %v4000_v35 = vld [vmem:[#allocation14 + $0x2a4] ss:$16 sps:$4 sm:$0xff]  }
 0x1c9   :  { %2111 = vmatpush1.bf16.msra.mxu1 %v3971_v51  ;;  %v917_v58 = vpop.f32.mrb[24].mxu0  ;;  %3752 = vmatprep.subr.bf16.mxu0 %v4087_v49 }
 0x1ca   :  { %2112 = vmatprep.subr.bf16.mxu1 %v3976_v52  ;;  %v3718_v62 = vpop.f32.mrb[25].mxu0 }
 0x1cb   :  { %v919_v1 = vpop.f32.mrb[26].mxu0  ;;  %v3994_v62 = vld [vmem:[#allocation14 + $0x264] ss:$16 sps:$4 sm:$0xff]  }
 0x1cc   :  { %v3719_v40 = vpop.f32.mrb[27].mxu0  ;;  %v3202_v1 = vmul.f32 %v3159_v17, %v3159_v17  ;;  %3753 = vmatpush3.bf16.msra.mxu0 %v4087_v49  ;;  %v4003_v17 = vld [vmem:[#allocation14 + $0x2c4] ss:$16 sps:$4 sm:$0xff]  }
 0x1cd   :  { %2113 = vmatpush1.bf16.msra.mxu1 %v3974_v50  ;;  %v3203_v40 = vmul.f32 %v3160_v63, %v3160_v63  ;;  %v4001_v63 = vld [vmem:[#allocation14 + $0x2c0] ss:$16 sps:$4 sm:$0xff]   ;;  %v4009_v49 = vld [vmem:[#allocation14 + $0x304] ss:$16 sps:$4 sm:$0xff]  }
 0x1ce   :  { %2114 = vmatprep.subr.bf16.mxu1 %v3979_v19 }
 0x1d1   :  { %2115 = vmatpush1.bf16.msra.mxu1 %v3977_v45  ;;  %v923_v11 = vpop.f32.mrb[28].mxu0 }
 0x1d2   :  { %2116 = vmatprep.subr.bf16.mxu1 %v3982_v4  ;;  %v3722_v31 = vpop.f32.mrb[29].mxu0 }
 0x1d3   :  { %v925_v22 = vpop.f32.mrb[30].mxu0  ;;  %v3177_v31 = vmul.f32 %v3153_v9, %v3153_v9  ;;  %v4007_v9 = vld [vmem:[#allocation14 + $0x300] ss:$16 sps:$4 sm:$0xff]  }
 0x1d4   :  { %v3723_v23 = vpop.f32.mrb[31].mxu0 }
 0x1d5   :  { %2117 = vmatpush1.bf16.msra.mxu1 %v3980_v10  ;;  %v4091_v10 = vld [vmem:[#allocation11 + $0x18] sm:$0xff]   ;;  %v3204_v23 = vmul.f32 %v3161_v15, %v3161_v15  ;;  %v4013_v15 = vld [vmem:[#allocation14 + $0x340] ss:$16 sps:$4 sm:$0xff]  }
 0x1d6   :  { %2129 = vmatprep.subr.bf16.mxu1 %v3985_v13  ;;  %v3997_v13 = vld [vmem:[#allocation14 + $0x284] ss:$16 sps:$4 sm:$0xff]   ;;  %3754 = vmatprep.subr.bf16.mxu0 %v4091_v10 }
 0x1d7   :  { %3755 = vmatpush3.bf16.msra.mxu0 %v4091_v10  ;;  %v4025_v10 = vld [vmem:[#allocation14 + $0x3c0] ss:$16 sps:$4 sm:$0xff]  }
 0x1d8   :  { %2119 = vmatmul.mubr.bf16.vlgmr.msra.gmra.mrb[28].mxu1 %v4857_v18 }
 0x1d9   :  { %2130 = vmatpush1.bf16.msra.mxu1 %v3983_v26  ;;  %v929_v38 = vpop.f32.mrb[32].mxu0  ;;  %2161 = vmatprep.mubr.bf16.mxu1 %v4895_v48 }
 0x1da   :  { %v4942_v41 = vadd.f32 %v3322_v28, %v929_v38  ;;  %2131 = vmatprep.subr.bf16.mxu1 %v3988_v42  ;;  %v3726_v6 = vpop.f32.mrb[33].mxu0 }
 0x1db   :  { %v932_v25 = vpop.f32.mrb[34].mxu0 }
 0x1dc   :  { %v3150_v14 = vsub.f32 %v4878_v3, %v4942_v41  ;;  %v3158_v51 = vsub.f32 %v4887_v36, %v4942_v41  ;;  %v4956_v52 = vadd.f32 %v3322_v28, %v932_v25  ;;  %v3727_v50 = vpop.f32.mrb[35].mxu0  ;;  %v3175_v3 = vmul.f32 %v3151_v55, %v3151_v55  ;;  %v3998_v55 = vld [vmem:[#allocation14 + $0x2a0] ss:$16 sps:$4 sm:$0xff]   ;;  %v4006_v25 = vld [vmem:[#allocation14 + $0x2e4] ss:$16 sps:$4 sm:$0xff]  }
 0x1dd   :  { %2132 = vmatpush1.bf16.msra.mxu1 %v3986_v39  ;;  %v3176_v36 = vmul.f32 %v3152_v43, %v3152_v43  ;;  %v4099_v39 = vld [vmem:[#allocation11 + $0x28] sm:$0xff]   ;;  %v4103_v43 = vld [vmem:[#allocation11 + $0x30] sm:$0xff]  }
 0x1de   :  { %v3174_v58 = vmul.f32 %v3150_v14, %v3150_v14  ;;  %v3201_v19 = vmul.f32 %v3158_v51, %v3158_v51  ;;  %2133 = vmatprep.subr.bf16.mxu1 %v3991_v53  ;;  %v3154_v57 = vsub.f32 %v4880_v7, %v4956_v52  ;;  %v3162_v11 = vsub.f32 %v4889_v37, %v4956_v52  ;;  %v3995_v7 = vld [vmem:[#allocation14 + $0x280] ss:$16 sps:$4 sm:$0xff]   ;;  %v4107_v14 = vld [vmem:[#allocation11 + $0x38] sm:$0xff]  }
 0x1df   :  { %v4004_v51 = vld [vmem:[#allocation14 + $0x2e0] ss:$16 sps:$4 sm:$0xff]   ;;  %v4113_v50 = vld [vmem:[#allocation14 + $0xc] ss:$16 sps:$4 sm:$0xff]  }
 0x1e0   :  { %v3181_v45 = vadd.f32 %v4927_v44, %v3174_v58  ;;  %v3208_v4 = vadd.f32 %v4929_v46, %v3201_v19  ;;  %v4095_v44 = vld [vmem:[#allocation11 + $0x20] sm:$0xff]   ;;  %v3178_v26 = vmul.f32 %v3154_v57, %v3154_v57  ;;  %v3205_v42 = vmul.f32 %v3162_v11, %v3162_v11 }
 0x1e1   :  { %2134 = vmatpush1.bf16.msra.mxu1 %v3989_v54  ;;  %3756 = vmatprep.subr.bf16.mxu0 %v4095_v44  ;;  %v4012_v54 = vld [vmem:[#allocation14 + $0x324] ss:$16 sps:$4 sm:$0xff]   ;;  %v4010_v58 = vld [vmem:[#allocation14 + $0x320] ss:$16 sps:$4 sm:$0xff]  }
 0x1e2   :  { %2135 = vmatprep.subr.bf16.mxu1 %v3994_v62  ;;  %v3182_v22 = vadd.f32 %v3181_v45, %v3175_v3  ;;  %v3209_v0 = vadd.f32 %v3208_v4, %v3202_v1  ;;  %3757 = vmatpush3.bf16.msra.mxu0 %v4095_v44  ;;  %v4015_v19 = vld [vmem:[#allocation14 + $0x344] ss:$16 sps:$4 sm:$0xff]   ;;  %v4016_v3 = vld [vmem:[#allocation14 + $0x360] ss:$16 sps:$4 sm:$0xff]  }
 0x1e3   :  { %3758 = vmatprep.subr.bf16.mxu0 %v4099_v39  ;;  %v4018_v62 = vld [vmem:[#allocation14 + $0x364] ss:$16 sps:$4 sm:$0xff]   ;;  %v4022_v45 = vld [vmem:[#allocation14 + $0x3a0] ss:$16 sps:$4 sm:$0xff]  }
 0x1e4   :  { %v3183_v46 = vadd.f32 %v3182_v22, %v3176_v36  ;;  %v3210_v28 = vadd.f32 %v3209_v0, %v3203_v40  ;;  %v4021_v1 = vld [vmem:[#allocation14 + $0x384] ss:$16 sps:$4 sm:$0xff]   ;;  %v4019_v36 = vld [vmem:[#allocation14 + $0x380] ss:$16 sps:$4 sm:$0xff]  }
 0x1e5   :  { %2136 = vmatpush1.bf16.msra.mxu1 %v3992_v20  ;;  %v4024_v40 = vld [vmem:[#allocation14 + $0x3a4] ss:$16 sps:$4 sm:$0xff]   ;;  %v4028_v11 = vld [vmem:[#allocation14 + $0x3e0] ss:$16 sps:$4 sm:$0xff]  }
 0x1e6   :  { %2137 = vmatprep.subr.bf16.mxu1 %v3997_v13  ;;  %v3184_v37 = vadd.f32 %v3183_v46, %v3177_v31  ;;  %v3211_v38 = vadd.f32 %v3210_v28, %v3204_v23  ;;  %3759 = vmatpush3.bf16.msra.mxu0 %v4099_v39  ;;  %v4027_v4 = vld [vmem:[#allocation14 + $0x3c4] ss:$16 sps:$4 sm:$0xff]   ;;  %v4031_v31 = vld [vmem:[#allocation12] ss:$16 sps:$4 sm:$0xff]  }
 0x1e7   :  { %3760 = vmatprep.subr.bf16.mxu0 %v4103_v43  ;;  %v4030_v57 = vld [vmem:[#allocation14 + $0x3e4] ss:$16 sps:$4 sm:$0xff]   ;;  %v4034_v22 = vld [vmem:[#allocation12 + $0x20] ss:$16 sps:$4 sm:$0xff]  }
 0x1e8   :  { %v4968_v53 = vadd.f32 %v3184_v37, %v3178_v26  ;;  %v4970_v6 = vadd.f32 %v3211_v38, %v3205_v42  ;;  %v4033_v20 = vld [vmem:[#allocation12 + $0x4] ss:$16 sps:$4 sm:$0xff]   ;;  %v4037_v0 = vld [vmem:[#allocation12 + $0x40] ss:$16 sps:$4 sm:$0xff]  }
 0x1e9   :  { %2138 = vmatpush1.bf16.msra.mxu1 %v3995_v7  ;;  %v4036_v13 = vld [vmem:[#allocation12 + $0x24] ss:$16 sps:$4 sm:$0xff]   ;;  %v4040_v26 = vld [vmem:[#allocation12 + $0x60] ss:$16 sps:$4 sm:$0xff]  }
 0x1ea   :  { %2139 = vmatprep.subr.bf16.mxu1 %v4000_v35  ;;  %3761 = vmatpush3.bf16.msra.mxu0 %v4103_v43  ;;  %v4039_v23 = vld [vmem:[#allocation12 + $0x44] ss:$16 sps:$4 sm:$0xff]   ;;  %v4043_v42 = vld [vmem:[#allocation12 + $0x80] ss:$16 sps:$4 sm:$0xff]  }
 0x1eb   :  { %3762 = vmatprep.subr.bf16.mxu0 %v4107_v14  ;;  %v4042_v44 = vld [vmem:[#allocation12 + $0x64] ss:$16 sps:$4 sm:$0xff]   ;;  %v4046_v7 = vld [vmem:[#allocation12 + $0xa0] ss:$16 sps:$4 sm:$0xff]  }
 0x1ec   :  { %v4045_v46 = vld [vmem:[#allocation12 + $0x84] ss:$16 sps:$4 sm:$0xff]   ;;  %v4049_v37 = vld [vmem:[#allocation12 + $0xc0] ss:$16 sps:$4 sm:$0xff]  }
 0x1ed   :  { %2140 = vmatpush1.bf16.msra.mxu1 %v3998_v55  ;;  %v4048_v28 = vld [vmem:[#allocation12 + $0xa4] ss:$16 sps:$4 sm:$0xff]   ;;  %v4052_v39 = vld [vmem:[#allocation12 + $0xe0] ss:$16 sps:$4 sm:$0xff]  }
 0x1ee   :  { %2141 = vmatprep.subr.bf16.mxu1 %v4003_v17  ;;  %3763 = vmatpush3.bf16.msra.mxu0 %v4107_v14  ;;  %v4051_v35 = vld [vmem:[#allocation12 + $0xc4] ss:$16 sps:$4 sm:$0xff]   ;;  %v4055_v17 = vld [vmem:[#allocation12 + $0x100] ss:$16 sps:$4 sm:$0xff]  }
 0x1ef   :  { %2172 = vmatprep.subr.bf16.mxu0 %v4113_v50  ;;  %v4054_v38 = vld [vmem:[#allocation12 + $0xe4] ss:$16 sps:$4 sm:$0xff]   ;;  %v4061_v14 = vld [vmem:[#allocation12 + $0x140] ss:$16 sps:$4 sm:$0xff]  }
 0x1f0   :  { %v4057_v55 = vld [vmem:[#allocation12 + $0x104] ss:$16 sps:$4 sm:$0xff]  }
 0x1f1   :  { %2142 = vmatpush1.bf16.msra.mxu1 %v4001_v63  ;;  %v4060_v43 = vld [vmem:[#allocation12 + $0x124] ss:$16 sps:$4 sm:$0xff]   ;;  %v4058_v63 = vld [vmem:[#allocation12 + $0x120] ss:$16 sps:$4 sm:$0xff]  }
 0x1f2   :  { %2143 = vmatprep.subr.bf16.mxu1 %v4006_v25  ;;  %v4063_v25 = vld [vmem:[#allocation12 + $0x144] ss:$16 sps:$4 sm:$0xff]  }
 0x1f3   :  { %v4069_v50 = vld [vmem:[#allocation12 + $0x184] ss:$16 sps:$4 sm:$0xff]  }
 0x1f5   :  { %2144 = vmatpush1.bf16.msra.mxu1 %v4004_v51  ;;  %v4066_v51 = vld [vmem:[#allocation12 + $0x164] ss:$16 sps:$4 sm:$0xff]  }
 0x1f6   :  { %2145 = vmatprep.subr.bf16.mxu1 %v4009_v49  ;;  %v4064_v49 = vld [vmem:[#allocation12 + $0x160] ss:$16 sps:$4 sm:$0xff]  }
 0x1f9   :  { %2146 = vmatpush1.bf16.msra.mxu1 %v4007_v9  ;;  %v4067_v9 = vld [vmem:[#allocation12 + $0x180] ss:$16 sps:$4 sm:$0xff]  }
 0x1fa   :  { %2147 = vmatprep.subr.bf16.mxu1 %v4012_v54  ;;  %v4072_v54 = vld [vmem:[#allocation12 + $0x1a4] ss:$16 sps:$4 sm:$0xff]  }
 0x1fd   :  { %2148 = vmatpush1.bf16.msra.mxu1 %v4010_v58  ;;  %v4070_v58 = vld [vmem:[#allocation12 + $0x1a0] ss:$16 sps:$4 sm:$0xff]  }
 0x1fe   :  { %2149 = vmatprep.subr.bf16.mxu1 %v4015_v19  ;;  %v4075_v19 = vld [vmem:[#allocation12 + $0x1c4] ss:$16 sps:$4 sm:$0xff]  }
 0x201   :  { %2150 = vmatpush1.bf16.msra.mxu1 %v4013_v15  ;;  %v4073_v15 = vld [vmem:[#allocation12 + $0x1c0] ss:$16 sps:$4 sm:$0xff]  }
 0x202   :  { %2151 = vmatprep.subr.bf16.mxu1 %v4018_v62  ;;  %v4078_v62 = vld [vmem:[#allocation12 + $0x1e4] ss:$16 sps:$4 sm:$0xff]  }
 0x205   :  { %2152 = vmatpush1.bf16.msra.mxu1 %v4016_v3  ;;  %v4076_v3 = vld [vmem:[#allocation12 + $0x1e0] ss:$16 sps:$4 sm:$0xff]  }
 0x206   :  { %2153 = vmatprep.subr.bf16.mxu1 %v4021_v1  ;;  %v4082_v1 = vld [vmem:[#allocation12 + $0x204] ss:$16 sps:$4 sm:$0xff]  }
 0x209   :  { %2154 = vmatpush1.bf16.msra.mxu1 %v4019_v36  ;;  %v4080_v36 = vld [vmem:[#allocation12 + $0x200] ss:$16 sps:$4 sm:$0xff]  }
 0x20a   :  { %2155 = vmatprep.subr.bf16.mxu1 %v4024_v40  ;;  %v4086_v40 = vld [vmem:[#allocation12 + $0x224] ss:$16 sps:$4 sm:$0xff]  }
 0x20d   :  { %2156 = vmatpush1.bf16.msra.mxu1 %v4022_v45  ;;  %v4084_v45 = vld [vmem:[#allocation12 + $0x220] ss:$16 sps:$4 sm:$0xff]  }
 0x20e   :  { %2157 = vmatprep.subr.bf16.mxu1 %v4027_v4  ;;  %v4090_v4 = vld [vmem:[#allocation12 + $0x244] ss:$16 sps:$4 sm:$0xff]  }
 0x211   :  { %2158 = vmatpush1.bf16.msra.mxu1 %v4025_v10  ;;  %v4088_v10 = vld [vmem:[#allocation12 + $0x240] ss:$16 sps:$4 sm:$0xff]  }
 0x212   :  { %2159 = vmatprep.subr.bf16.mxu1 %v4030_v57  ;;  %v4094_v57 = vld [vmem:[#allocation12 + $0x264] ss:$16 sps:$4 sm:$0xff]  }
 0x215   :  { %2160 = vmatpush1.bf16.msra.mxu1 %v4028_v11  ;;  %v4092_v11 = vld [vmem:[#allocation12 + $0x260] ss:$16 sps:$4 sm:$0xff]  }
 0x216   :  { %2898 = vmatprep.subr.bf16.mxu1 %v4033_v20  ;;  %v4098_v20 = vld [vmem:[#allocation12 + $0x284] ss:$16 sps:$4 sm:$0xff]  }
 0x218   :  { %2162 = vmatmul.mubr.bf16.vlgmr.msra.gmra.mrb[28].mxu1 %v4869_v24 }
 0x219   :  { %2899 = vmatpush1.bf16.msra.mxu1 %v4031_v31  ;;  %2930 = vmatprep.mubr.bf16.mxu1 %v4841_v59  ;;  %v4096_v31 = vld [vmem:[#allocation12 + $0x280] ss:$16 sps:$4 sm:$0xff]  }
 0x21a   :  { %2900 = vmatprep.subr.bf16.mxu1 %v4036_v13  ;;  %v4102_v13 = vld [vmem:[#allocation12 + $0x2a4] ss:$16 sps:$4 sm:$0xff]  }
 0x21d   :  { %2901 = vmatpush1.bf16.msra.mxu1 %v4034_v22  ;;  %v3395_v22 = vld [vmem:[#allocation15 + $0x9] ss:$0 sm:$0xff] }
 0x21e   :  { %2902 = vmatprep.subr.bf16.mxu1 %v4039_v23  ;;  %v4100_v23 = vld [vmem:[#allocation12 + $0x2a0] ss:$16 sps:$4 sm:$0xff]  }
 0x221   :  { %2903 = vmatpush1.bf16.msra.mxu1 %v4037_v0  ;;  %v4106_v0 = vld [vmem:[#allocation12 + $0x2c4] ss:$16 sps:$4 sm:$0xff]  }
 0x222   :  { %2904 = vmatprep.subr.bf16.mxu1 %v4042_v44 }
 0x225   :  { %2905 = vmatpush1.bf16.msra.mxu1 %v4040_v26 }
 0x226   :  { %2906 = vmatprep.subr.bf16.mxu1 %v4045_v46 }
 0x229   :  { %2907 = vmatpush1.bf16.msra.mxu1 %v4043_v42 }
 0x22a   :  { %2908 = vmatprep.subr.bf16.mxu1 %v4048_v28 }
 0x22d   :  { %2909 = vmatpush1.bf16.msra.mxu1 %v4046_v7  ;;  %v4104_v7 = vld [vmem:[#allocation12 + $0x2c0] ss:$16 sps:$4 sm:$0xff]  }
 0x22e   :  { %2910 = vmatprep.subr.bf16.mxu1 %v4051_v35 }
 0x231   :  { %2911 = vmatpush1.bf16.msra.mxu1 %v4049_v37 }
 0x232   :  { %2912 = vmatprep.subr.bf16.mxu1 %v4054_v38  ;;  %v4110_v38 = vld [vmem:[#allocation12 + $0x2e4] ss:$16 sps:$4 sm:$0xff]  }
 0x235   :  { %2913 = vmatpush1.bf16.msra.mxu1 %v4052_v39 }
 0x236   :  { %2914 = vmatprep.subr.bf16.mxu1 %v4057_v55 }
 0x239   :  { %2915 = vmatpush1.bf16.msra.mxu1 %v4055_v17 }
 0x23a   :  { %2916 = vmatprep.subr.bf16.mxu1 %v4060_v43 }
 0x23d   :  { %2917 = vmatpush1.bf16.msra.mxu1 %v4058_v63 }
 0x23e   :  { %2918 = vmatprep.subr.bf16.mxu1 %v4063_v25  ;;  %v4108_v25 = vld [vmem:[#allocation12 + $0x2e0] ss:$16 sps:$4 sm:$0xff]  }
 0x241   :  { %2919 = vmatpush1.bf16.msra.mxu1 %v4061_v14 }
 0x242   :  { %2920 = vmatprep.subr.bf16.mxu1 %v4066_v51  ;;  %v4116_v51 = vld [vmem:[#allocation12 + $0x304] ss:$16 sps:$4 sm:$0xff]  }
 0x245   :  { %2921 = vmatpush1.bf16.msra.mxu1 %v4064_v49 }
 0x246   :  { %2922 = vmatprep.subr.bf16.mxu1 %v4069_v50  ;;  %v4111_v50 = vld [vmem:[#allocation14 + $0x8] ss:$16 sps:$4 sm:$0xff]  }
 0x249   :  { %2923 = vmatpush1.bf16.msra.mxu1 %v4067_v9  ;;  %v4119_v9 = vld [vmem:[#allocation14 + $0x2c] ss:$16 sps:$4 sm:$0xff]  }
 0x24a   :  { %2924 = vmatprep.subr.bf16.mxu1 %v4072_v54  ;;  %v4114_v54 = vld [vmem:[#allocation12 + $0x300] ss:$16 sps:$4 sm:$0xff]  }
 0x24d   :  { %2925 = vmatpush1.bf16.msra.mxu1 %v4070_v58  ;;  %v4122_v58 = vld [vmem:[#allocation12 + $0x324] ss:$16 sps:$4 sm:$0xff]  }
 0x24e   :  { %2926 = vmatprep.subr.bf16.mxu1 %v4075_v19  ;;  %v4117_v19 = vld [vmem:[#allocation14 + $0x28] ss:$16 sps:$4 sm:$0xff]  }
 0x251   :  { %2927 = vmatpush1.bf16.msra.mxu1 %v4073_v15  ;;  %v4125_v15 = vld [vmem:[#allocation14 + $0x4c] ss:$16 sps:$4 sm:$0xff]  }
 0x252   :  { %2928 = vmatprep.subr.bf16.mxu1 %v4078_v62  ;;  %v4120_v62 = vld [vmem:[#allocation12 + $0x320] ss:$16 sps:$4 sm:$0xff]  }
 0x255   :  { %2929 = vmatpush1.bf16.msra.mxu1 %v4076_v3  ;;  %v4128_v3 = vld [vmem:[#allocation12 + $0x344] ss:$16 sps:$4 sm:$0xff]  }
 0x256   :  { %2941 = vmatprep.subr.bf16.mxu1 %v4082_v1  ;;  %v4123_v1 = vld [vmem:[#allocation14 + $0x48] ss:$16 sps:$4 sm:$0xff]  }
 0x258   :  { %2931 = vmatmul.mubr.bf16.vlgmr.msra.gmra.mrb[28].mxu1 %v4835_v56 }
 0x259   :  { %2942 = vmatpush1.bf16.msra.mxu1 %v4080_v36  ;;  %2973 = vmatprep.mubr.bf16.mxu1 %v4884_v16  ;;  %v4131_v36 = vld [vmem:[#allocation14 + $0x6c] ss:$16 sps:$4 sm:$0xff]  }
 0x25a   :  { %2943 = vmatprep.subr.bf16.mxu1 %v4086_v40  ;;  %v4126_v40 = vld [vmem:[#allocation12 + $0x340] ss:$16 sps:$4 sm:$0xff]  }
 0x25d   :  { %2944 = vmatpush1.bf16.msra.mxu1 %v4084_v45  ;;  %v4134_v45 = vld [vmem:[#allocation12 + $0x364] ss:$16 sps:$4 sm:$0xff]  }
 0x25e   :  { %2945 = vmatprep.subr.bf16.mxu1 %v4090_v4  ;;  %v4129_v4 = vld [vmem:[#allocation14 + $0x68] ss:$16 sps:$4 sm:$0xff]  }
 0x261   :  { %2946 = vmatpush1.bf16.msra.mxu1 %v4088_v10  ;;  %v4137_v10 = vld [vmem:[#allocation14 + $0x8c] ss:$16 sps:$4 sm:$0xff]  }
 0x262   :  { %2947 = vmatprep.subr.bf16.mxu1 %v4094_v57  ;;  %v4140_v57 = vld [vmem:[#allocation12 + $0x384] ss:$16 sps:$4 sm:$0xff]  }
 0x265   :  { %2948 = vmatpush1.bf16.msra.mxu1 %v4092_v11  ;;  %v4135_v11 = vld [vmem:[#allocation14 + $0x88] ss:$16 sps:$4 sm:$0xff]  }
 0x266   :  { %2949 = vmatprep.subr.bf16.mxu1 %v4098_v20  ;;  %v4143_v20 = vld [vmem:[#allocation14 + $0xac] ss:$16 sps:$4 sm:$0xff]  }
 0x269   :  { %2950 = vmatpush1.bf16.msra.mxu1 %v4096_v31  ;;  %v4138_v31 = vld [vmem:[#allocation12 + $0x380] ss:$16 sps:$4 sm:$0xff]  }
 0x26a   :  { %2951 = vmatprep.subr.bf16.mxu1 %v4102_v13  ;;  %v4146_v13 = vld [vmem:[#allocation12 + $0x3a4] ss:$16 sps:$4 sm:$0xff]  }
 0x26b   :  { %v3746_v44 = vpop.f32.mrb[24].mxu1 }
 0x26c   :  { %v1051_v26 = vadd.f32 %v3746_v44, %v3395_v22  ;;  %v1042_v46 = vpop.f32.mrb[25].mxu1  ;;  %v4152_v44 = vld [vmem:[#allocation12 + $0x3c4] ss:$16 sps:$4 sm:$0xff]  }
 0x26d   :  { %v1043_v42 = vadd.f32 %v3395_v22, %v1042_v46  ;;  %2952 = vmatpush1.bf16.msra.mxu1 %v4100_v23  ;;  %v3747_v28 = vpop.f32.mrb[26].mxu1  ;;  %v4149_v23 = vld [vmem:[#allocation14 + $0xcc] ss:$16 sps:$4 sm:$0xff]  }
 0x26e   :  { %v1054_v35 = vadd.f32 %v3747_v28, %v3395_v22  ;;  %v1045_v37 = vpop.f32.mrb[27].mxu1  ;;  %2953 = vmatprep.subr.bf16.mxu1 %v4106_v0  ;;  %v1059_v55 = vmax.f32 %v1051_v26, 0.0  ;;  %v4144_v0 = vld [vmem:[#allocation12 + $0x3a0] ss:$16 sps:$4 sm:$0xff]   ;;  %v4147_v26 = vld [vmem:[#allocation14 + $0xc8] ss:$16 sps:$4 sm:$0xff]  }
 0x26f   :  { %v1046_v39 = vadd.f32 %v3395_v22, %v1045_v37  ;;  %v1057_v43 = vmax.f32 %v1043_v42, 0.0  ;;  %v4141_v22 = vld [vmem:[#allocation14 + $0xa8] ss:$16 sps:$4 sm:$0xff]   ;;  %v4155_v46 = vld [vmem:[#allocation14 + $0xec] ss:$16 sps:$4 sm:$0xff]  }
 0x270   :  { %v1060_v17 = vmax.f32 %v1054_v35, 0.0  ;;  %v4150_v42 = vld [vmem:[#allocation12 + $0x3c0] ss:$16 sps:$4 sm:$0xff]   ;;  %v4158_v28 = vld [vmem:[#allocation12 + $0x3e4] ss:$16 sps:$4 sm:$0xff]  }
 0x271   :  { %v1058_v63 = vmax.f32 %v1046_v39, 0.0  ;;  %2954 = vmatpush1.bf16.msra.mxu1 %v4104_v7  ;;  %v4153_v7 = vld [vmem:[#allocation14 + $0xe8] ss:$16 sps:$4 sm:$0xff]   ;;  %v4161_v35 = vld [vmem:[#allocation14 + $0x10c] ss:$16 sps:$4 sm:$0xff]  }
 0x272   :  { %v1062_v14 = vpack.c.bf16 %v1060_v17, %v1059_v55  ;;  %2955 = vmatprep.subr.bf16.mxu1 %v4110_v38  ;;  %v4156_v37 = vld [vmem:[#allocation12 + $0x3e0] ss:$16 sps:$4 sm:$0xff]   ;;  %v4159_v38 = vld [vmem:[#allocation14 + $0x108] ss:$16 sps:$4 sm:$0xff]   ;;  %v4164_v39 = vld [vmem:[#allocation14 + $0x12c] ss:$16 sps:$4 sm:$0xff]  }
 0x273   :  { %v1061_v49 = vpack.c.bf16 %v1058_v63, %v1057_v43  ;;  %v4162_v55 = vld [vmem:[#allocation14 + $0x128] ss:$16 sps:$4 sm:$0xff]   ;;  %v4167_v17 = vld [vmem:[#allocation14 + $0x14c] ss:$16 sps:$4 sm:$0xff]  }
 0x274   :  { %v4165_v43 = vld [vmem:[#allocation14 + $0x148] ss:$16 sps:$4 sm:$0xff]   ;;  %v4170_v63 = vld [vmem:[#allocation14 + $0x16c] ss:$16 sps:$4 sm:$0xff]  }
 0x275   :  { %2956 = vmatpush1.bf16.msra.mxu1 %v4108_v25  ;;  %3764 = vmatprep.mubr.bf16.mxu0 %v1061_v49  ;;  %v4168_v25 = vld [vmem:[#allocation14 + $0x168] ss:$16 sps:$4 sm:$0xff]   ;;  %v4176_v49 = vld [vmem:[#allocation14 + $0x1ac] ss:$16 sps:$4 sm:$0xff]  }
 0x276   :  { %3765 = vmatmul.mubr.bf16.vlgmr.msra.gmra.mrb[36].mxu0 %v1062_v14  ;;  %2957 = vmatprep.subr.bf16.mxu1 %v4116_v51  ;;  %v4173_v14 = vld [vmem:[#allocation14 + $0x18c] ss:$16 sps:$4 sm:$0xff]   ;;  %v4171_v51 = vld [vmem:[#allocation14 + $0x188] ss:$16 sps:$4 sm:$0xff]  }
 0x277   :  { %2173 = vmatpush1.bf16.msra.mxu0 %v4111_v50  ;;  %2204 = vmatprep.mubr.bf16.mxu0 %v4865_v21  ;;  %v4132_v21 = vld [vmem:[#allocation12 + $0x360] ss:$16 sps:$4 sm:$0xff]   ;;  %v4174_v50 = vld [vmem:[#allocation14 + $0x1a8] ss:$16 sps:$4 sm:$0xff]  }
 0x278   :  { %2174 = vmatprep.subr.bf16.mxu0 %v4119_v9  ;;  %v4179_v9 = vld [vmem:[#allocation14 + $0x1cc] ss:$16 sps:$4 sm:$0xff]  }
 0x279   :  { %2958 = vmatpush1.bf16.msra.mxu1 %v4114_v54  ;;  %v4177_v54 = vld [vmem:[#allocation14 + $0x1c8] ss:$16 sps:$4 sm:$0xff]  }
 0x27a   :  { %2959 = vmatprep.subr.bf16.mxu1 %v4122_v58  ;;  %v4182_v58 = vld [vmem:[#allocation14 + $0x1ec] ss:$16 sps:$4 sm:$0xff]  }
 0x27b   :  { %2175 = vmatpush1.bf16.msra.mxu0 %v4117_v19  ;;  %v4180_v19 = vld [vmem:[#allocation14 + $0x1e8] ss:$16 sps:$4 sm:$0xff]  }
 0x27c   :  { %2176 = vmatprep.subr.bf16.mxu0 %v4125_v15  ;;  %v4185_v15 = vld [vmem:[#allocation14 + $0x20c] ss:$16 sps:$4 sm:$0xff]  }
 0x27d   :  { %2960 = vmatpush1.bf16.msra.mxu1 %v4120_v62  ;;  %v4183_v62 = vld [vmem:[#allocation14 + $0x208] ss:$16 sps:$4 sm:$0xff]  }
 0x27e   :  { %2961 = vmatprep.subr.bf16.mxu1 %v4128_v3  ;;  %v4188_v3 = vld [vmem:[#allocation14 + $0x22c] ss:$16 sps:$4 sm:$0xff]  }
 0x27f   :  { %2177 = vmatpush1.bf16.msra.mxu0 %v4123_v1  ;;  %v4186_v1 = vld [vmem:[#allocation14 + $0x228] ss:$16 sps:$4 sm:$0xff]  }
 0x280   :  { %2178 = vmatprep.subr.bf16.mxu0 %v4131_v36  ;;  %v4191_v36 = vld [vmem:[#allocation14 + $0x24c] ss:$16 sps:$4 sm:$0xff]  }
 0x281   :  { %2962 = vmatpush1.bf16.msra.mxu1 %v4126_v40  ;;  %v4189_v40 = vld [vmem:[#allocation14 + $0x248] ss:$16 sps:$4 sm:$0xff]  }
 0x282   :  { %2963 = vmatprep.subr.bf16.mxu1 %v4134_v45  ;;  %v4194_v45 = vld [vmem:[#allocation14 + $0x26c] ss:$16 sps:$4 sm:$0xff]  }
 0x283   :  { %2179 = vmatpush1.bf16.msra.mxu0 %v4129_v4  ;;  %v4192_v4 = vld [vmem:[#allocation14 + $0x268] ss:$16 sps:$4 sm:$0xff]  }
 0x284   :  { %2180 = vmatprep.subr.bf16.mxu0 %v4137_v10  ;;  %v4197_v10 = vld [vmem:[#allocation14 + $0x28c] ss:$16 sps:$4 sm:$0xff]  }
 0x285   :  { %2964 = vmatpush1.bf16.msra.mxu1 %v4132_v21  ;;  %v4195_v21 = vld [vmem:[#allocation14 + $0x288] ss:$16 sps:$4 sm:$0xff]  }
 0x286   :  { %2965 = vmatprep.subr.bf16.mxu1 %v4140_v57  ;;  %v4200_v57 = vld [vmem:[#allocation14 + $0x2ac] ss:$16 sps:$4 sm:$0xff]  }
 0x287   :  { %2181 = vmatpush1.bf16.msra.mxu0 %v4135_v11  ;;  %v4203_v11 = vld [vmem:[#allocation14 + $0x2cc] ss:$16 sps:$4 sm:$0xff]  }
 0x288   :  { %2182 = vmatprep.subr.bf16.mxu0 %v4143_v20  ;;  %v4206_v20 = vld [vmem:[#allocation14 + $0x2ec] ss:$16 sps:$4 sm:$0xff]  }
 0x289   :  { %2966 = vmatpush1.bf16.msra.mxu1 %v4138_v31  ;;  %v4204_v31 = vld [vmem:[#allocation14 + $0x2e8] ss:$16 sps:$4 sm:$0xff]  }
 0x28a   :  { %2967 = vmatprep.subr.bf16.mxu1 %v4146_v13  ;;  %v4209_v13 = vld [vmem:[#allocation14 + $0x30c] ss:$16 sps:$4 sm:$0xff]  }
 0x28b   :  { %2183 = vmatpush1.bf16.msra.mxu0 %v4141_v22  ;;  %v4207_v22 = vld [vmem:[#allocation14 + $0x308] ss:$16 sps:$4 sm:$0xff]  }
 0x28c   :  { %2184 = vmatprep.subr.bf16.mxu0 %v4149_v23  ;;  %v4212_v23 = vld [vmem:[#allocation14 + $0x32c] ss:$16 sps:$4 sm:$0xff]  }
 0x28d   :  { %2968 = vmatpush1.bf16.msra.mxu1 %v4144_v0  ;;  %v4210_v0 = vld [vmem:[#allocation14 + $0x328] ss:$16 sps:$4 sm:$0xff]  }
 0x28e   :  { %2969 = vmatprep.subr.bf16.mxu1 %v4152_v44  ;;  %v4215_v44 = vld [vmem:[#allocation14 + $0x34c] ss:$16 sps:$4 sm:$0xff]  }
 0x28f   :  { %2185 = vmatpush1.bf16.msra.mxu0 %v4147_v26  ;;  %v4213_v26 = vld [vmem:[#allocation14 + $0x348] ss:$16 sps:$4 sm:$0xff]  }
 0x290   :  { %2186 = vmatprep.subr.bf16.mxu0 %v4155_v46  ;;  %v4218_v46 = vld [vmem:[#allocation14 + $0x36c] ss:$16 sps:$4 sm:$0xff]  }
 0x291   :  { %2970 = vmatpush1.bf16.msra.mxu1 %v4150_v42  ;;  %v4216_v42 = vld [vmem:[#allocation14 + $0x368] ss:$16 sps:$4 sm:$0xff]  }
 0x292   :  { %2971 = vmatprep.subr.bf16.mxu1 %v4158_v28  ;;  %v4221_v28 = vld [vmem:[#allocation14 + $0x38c] ss:$16 sps:$4 sm:$0xff]  }
 0x293   :  { %2187 = vmatpush1.bf16.msra.mxu0 %v4153_v7  ;;  %v4219_v7 = vld [vmem:[#allocation14 + $0x388] ss:$16 sps:$4 sm:$0xff]  }
 0x294   :  { %2188 = vmatprep.subr.bf16.mxu0 %v4161_v35  ;;  %v4224_v35 = vld [vmem:[#allocation14 + $0x3ac] ss:$16 sps:$4 sm:$0xff]  }
 0x295   :  { %2972 = vmatpush1.bf16.msra.mxu1 %v4156_v37  ;;  %v4222_v37 = vld [vmem:[#allocation14 + $0x3a8] ss:$16 sps:$4 sm:$0xff]  }
 0x297   :  { %2189 = vmatpush1.bf16.msra.mxu0 %v4159_v38  ;;  %v4227_v38 = vld [vmem:[#allocation14 + $0x3cc] ss:$16 sps:$4 sm:$0xff]  }
 0x298   :  { %2974 = vmatmul.mubr.bf16.vlgmr.msra.gmra.mrb[28].mxu1 %v4845_v61  ;;  %2190 = vmatprep.subr.bf16.mxu0 %v4164_v39  ;;  %v4225_v39 = vld [vmem:[#allocation14 + $0x3c8] ss:$16 sps:$4 sm:$0xff]  }
 0x29b   :  { %2191 = vmatpush1.bf16.msra.mxu0 %v4162_v55  ;;  %v4230_v55 = vld [vmem:[#allocation14 + $0x3ec] ss:$16 sps:$4 sm:$0xff]  }
 0x29c   :  { %2192 = vmatprep.subr.bf16.mxu0 %v4167_v17  ;;  %v4228_v17 = vld [vmem:[#allocation14 + $0x3e8] ss:$16 sps:$4 sm:$0xff]  }
 0x29f   :  { %2193 = vmatpush1.bf16.msra.mxu0 %v4165_v43  ;;  %v4233_v43 = vld [vmem:[#allocation12 + $0xc] ss:$16 sps:$4 sm:$0xff]  }
 0x2a0   :  { %2194 = vmatprep.subr.bf16.mxu0 %v4170_v63  ;;  %v4231_v63 = vld [vmem:[#allocation12 + $0x8] ss:$16 sps:$4 sm:$0xff]  }
 0x2a3   :  { %2195 = vmatpush1.bf16.msra.mxu0 %v4168_v25  ;;  %v4236_v25 = vld [vmem:[#allocation12 + $0x2c] ss:$16 sps:$4 sm:$0xff]  }
 0x2a4   :  { %2196 = vmatprep.subr.bf16.mxu0 %v4173_v14  ;;  %v4234_v14 = vld [vmem:[#allocation12 + $0x28] ss:$16 sps:$4 sm:$0xff]  }
 0x2a7   :  { %2197 = vmatpush1.bf16.msra.mxu0 %v4171_v51  ;;  %v4239_v51 = vld [vmem:[#allocation12 + $0x4c] ss:$16 sps:$4 sm:$0xff]  }
 0x2a8   :  { %2198 = vmatprep.subr.bf16.mxu0 %v4176_v49  ;;  %v4237_v49 = vld [vmem:[#allocation12 + $0x48] ss:$16 sps:$4 sm:$0xff]  }
 0x2ab   :  { %2199 = vmatpush1.bf16.msra.mxu0 %v4174_v50  ;;  %v4242_v50 = vld [vmem:[#allocation12 + $0x6c] ss:$16 sps:$4 sm:$0xff]  }
 0x2ac   :  { %2200 = vmatprep.subr.bf16.mxu0 %v4179_v9  ;;  %v4240_v9 = vld [vmem:[#allocation12 + $0x68] ss:$16 sps:$4 sm:$0xff]  }
 0x2af   :  { %2201 = vmatpush1.bf16.msra.mxu0 %v4177_v54  ;;  %v4245_v54 = vld [vmem:[#allocation12 + $0x8c] ss:$16 sps:$4 sm:$0xff]  }
 0x2b0   :  { %2202 = vmatprep.subr.bf16.mxu0 %v4182_v58  ;;  %v4243_v58 = vld [vmem:[#allocation12 + $0x88] ss:$16 sps:$4 sm:$0xff]  }
 0x2b3   :  { %2203 = vmatpush1.bf16.msra.mxu0 %v4180_v19  ;;  %v4248_v19 = vld [vmem:[#allocation12 + $0xac] ss:$16 sps:$4 sm:$0xff]  }
 0x2b4   :  { %2215 = vmatprep.subr.bf16.mxu0 %v4185_v15  ;;  %v4251_v15 = vld [vmem:[#allocation12 + $0xcc] ss:$16 sps:$4 sm:$0xff]  }
 0x2b6   :  { %2205 = vmatmul.mubr.bf16.vlgmr.msra.gmra.mrb[40].mxu0 %v4857_v18  ;;  %v4198_v18 = vld [vmem:[#allocation14 + $0x2a8] ss:$16 sps:$4 sm:$0xff]  }
 0x2b7   :  { %2216 = vmatpush1.bf16.msra.mxu0 %v4183_v62  ;;  %2247 = vmatprep.mubr.bf16.mxu0 %v4895_v48  ;;  %v4201_v48 = vld [vmem:[#allocation14 + $0x2c8] ss:$16 sps:$4 sm:$0xff]   ;;  %v4254_v62 = vld [vmem:[#allocation12 + $0xec] ss:$16 sps:$4 sm:$0xff]  }
 0x2b8   :  { %2217 = vmatprep.subr.bf16.mxu0 %v4188_v3  ;;  %v4252_v3 = vld [vmem:[#allocation12 + $0xe8] ss:$16 sps:$4 sm:$0xff]  }
 0x2bb   :  { %2218 = vmatpush1.bf16.msra.mxu0 %v4186_v1  ;;  %v4257_v1 = vld [vmem:[#allocation12 + $0x10c] ss:$16 sps:$4 sm:$0xff]  }
 0x2bc   :  { %2219 = vmatprep.subr.bf16.mxu0 %v4191_v36  ;;  %v4255_v36 = vld [vmem:[#allocation12 + $0x108] ss:$16 sps:$4 sm:$0xff]  }
 0x2bf   :  { %2220 = vmatpush1.bf16.msra.mxu0 %v4189_v40  ;;  %v4260_v40 = vld [vmem:[#allocation12 + $0x12c] ss:$16 sps:$4 sm:$0xff]  }
 0x2c0   :  { %2221 = vmatprep.subr.bf16.mxu0 %v4194_v45  ;;  %v4258_v45 = vld [vmem:[#allocation12 + $0x128] ss:$16 sps:$4 sm:$0xff]  }
 0x2c3   :  { %2222 = vmatpush1.bf16.msra.mxu0 %v4192_v4  ;;  %v4263_v4 = vld [vmem:[#allocation12 + $0x14c] ss:$16 sps:$4 sm:$0xff]  }
 0x2c4   :  { %2223 = vmatprep.subr.bf16.mxu0 %v4197_v10  ;;  %v4261_v10 = vld [vmem:[#allocation12 + $0x148] ss:$16 sps:$4 sm:$0xff]  }
 0x2c7   :  { %2224 = vmatpush1.bf16.msra.mxu0 %v4195_v21  ;;  %v4266_v21 = vld [vmem:[#allocation12 + $0x16c] ss:$16 sps:$4 sm:$0xff]  }
 0x2c8   :  { %2225 = vmatprep.subr.bf16.mxu0 %v4200_v57  ;;  %v4264_v57 = vld [vmem:[#allocation12 + $0x168] ss:$16 sps:$4 sm:$0xff]  }
 0x2cb   :  { %2226 = vmatpush1.bf16.msra.mxu0 %v4198_v18  ;;  %v4269_v18 = vld [vmem:[#allocation12 + $0x18c] ss:$16 sps:$4 sm:$0xff]  }
 0x2cc   :  { %2227 = vmatprep.subr.bf16.mxu0 %v4203_v11  ;;  %v4267_v11 = vld [vmem:[#allocation12 + $0x188] ss:$16 sps:$4 sm:$0xff]  }
 0x2cf   :  { %2228 = vmatpush1.bf16.msra.mxu0 %v4201_v48  ;;  %v4272_v48 = vld [vmem:[#allocation12 + $0x1ac] ss:$16 sps:$4 sm:$0xff]  }
 0x2d0   :  { %2229 = vmatprep.subr.bf16.mxu0 %v4206_v20  ;;  %v4270_v20 = vld [vmem:[#allocation12 + $0x1a8] ss:$16 sps:$4 sm:$0xff]  }
 0x2d3   :  { %2230 = vmatpush1.bf16.msra.mxu0 %v4204_v31  ;;  %v4275_v31 = vld [vmem:[#allocation12 + $0x1cc] ss:$16 sps:$4 sm:$0xff]  }
 0x2d4   :  { %2231 = vmatprep.subr.bf16.mxu0 %v4209_v13  ;;  %v4273_v13 = vld [vmem:[#allocation12 + $0x1c8] ss:$16 sps:$4 sm:$0xff]  }
 0x2d7   :  { %2232 = vmatpush1.bf16.msra.mxu0 %v4207_v22  ;;  %v4278_v22 = vld [vmem:[#allocation12 + $0x1ec] ss:$16 sps:$4 sm:$0xff]  }
 0x2d8   :  { %2233 = vmatprep.subr.bf16.mxu0 %v4212_v23  ;;  %v4276_v23 = vld [vmem:[#allocation12 + $0x1e8] ss:$16 sps:$4 sm:$0xff]  }
 0x2db   :  { %2234 = vmatpush1.bf16.msra.mxu0 %v4210_v0  ;;  %v4281_v0 = vld [vmem:[#allocation12 + $0x20c] ss:$16 sps:$4 sm:$0xff]  }
 0x2dc   :  { %2235 = vmatprep.subr.bf16.mxu0 %v4215_v44  ;;  %v4279_v44 = vld [vmem:[#allocation12 + $0x208] ss:$16 sps:$4 sm:$0xff]  }
 0x2df   :  { %2236 = vmatpush1.bf16.msra.mxu0 %v4213_v26  ;;  %v4284_v26 = vld [vmem:[#allocation12 + $0x22c] ss:$16 sps:$4 sm:$0xff]  }
 0x2e0   :  { %2237 = vmatprep.subr.bf16.mxu0 %v4218_v46  ;;  %v4282_v46 = vld [vmem:[#allocation12 + $0x228] ss:$16 sps:$4 sm:$0xff]  }
 0x2e3   :  { %2238 = vmatpush1.bf16.msra.mxu0 %v4216_v42  ;;  %v4287_v42 = vld [vmem:[#allocation12 + $0x24c] ss:$16 sps:$4 sm:$0xff]  }
 0x2e4   :  { %2239 = vmatprep.subr.bf16.mxu0 %v4221_v28  ;;  %v4285_v28 = vld [vmem:[#allocation12 + $0x248] ss:$16 sps:$4 sm:$0xff]  }
 0x2e7   :  { %2240 = vmatpush1.bf16.msra.mxu0 %v4219_v7  ;;  %v4290_v7 = vld [vmem:[#allocation12 + $0x26c] ss:$16 sps:$4 sm:$0xff]  }
 0x2e8   :  { %2241 = vmatprep.subr.bf16.mxu0 %v4224_v35  ;;  %v4288_v35 = vld [vmem:[#allocation12 + $0x268] ss:$16 sps:$4 sm:$0xff]  }
 0x2eb   :  { %2242 = vmatpush1.bf16.msra.mxu0 %v4222_v37  ;;  %v4293_v37 = vld [vmem:[#allocation12 + $0x28c] ss:$16 sps:$4 sm:$0xff]  }
 0x2ec   :  { %2243 = vmatprep.subr.bf16.mxu0 %v4227_v38  ;;  %v4291_v38 = vld [vmem:[#allocation12 + $0x288] ss:$16 sps:$4 sm:$0xff]  }
 0x2ef   :  { %2244 = vmatpush1.bf16.msra.mxu0 %v4225_v39  ;;  %v4296_v39 = vld [vmem:[#allocation12 + $0x2ac] ss:$16 sps:$4 sm:$0xff]  }
 0x2f0   :  { %2245 = vmatprep.subr.bf16.mxu0 %v4230_v55  ;;  %v4294_v55 = vld [vmem:[#allocation12 + $0x2a8] ss:$16 sps:$4 sm:$0xff]  }
 0x2f3   :  { %2246 = vmatpush1.bf16.msra.mxu0 %v4228_v17 }
 0x2f4   :  { %2984 = vmatprep.subr.bf16.mxu0 %v4233_v43 }
 0x2f6   :  { %2248 = vmatmul.mubr.bf16.vlgmr.msra.gmra.mrb[40].mxu0 %v4869_v24  ;;  %v4246_v24 = vld [vmem:[#allocation12 + $0xa8] ss:$16 sps:$4 sm:$0xff]  }
 0x2f7   :  { %2985 = vmatpush1.bf16.msra.mxu0 %v4231_v63  ;;  %3016 = vmatprep.mubr.bf16.mxu0 %v4841_v59  ;;  %v4249_v59 = vld [vmem:[#allocation12 + $0xc8] ss:$16 sps:$4 sm:$0xff]  }
 0x2f8   :  { %2986 = vmatprep.subr.bf16.mxu0 %v4236_v25 }
 0x2fb   :  { %2987 = vmatpush1.bf16.msra.mxu0 %v4234_v14 }
 0x2fc   :  { %2988 = vmatprep.subr.bf16.mxu0 %v4239_v51  ;;  %v4297_v51 = vld [vmem:[#allocation12 + $0x2c8] ss:$16 sps:$4 sm:$0xff]  }
 0x2ff   :  { %2989 = vmatpush1.bf16.msra.mxu0 %v4237_v49 }
 0x300   :  { %2990 = vmatprep.subr.bf16.mxu0 %v4242_v50 }
 0x303   :  { %2991 = vmatpush1.bf16.msra.mxu0 %v4240_v9 }
 0x304   :  { %2992 = vmatprep.subr.bf16.mxu0 %v4245_v54  ;;  %v4302_v54 = vld [vmem:[#allocation12 + $0x2ec] ss:$16 sps:$4 sm:$0xff]  }
 0x307   :  { %2993 = vmatpush1.bf16.msra.mxu0 %v4243_v58 }
 0x308   :  { %2994 = vmatprep.subr.bf16.mxu0 %v4248_v19 }
 0x30b   :  { %2995 = vmatpush1.bf16.msra.mxu0 %v4246_v24 }
 0x30c   :  { %2996 = vmatprep.subr.bf16.mxu0 %v4251_v15  ;;  %v4300_v15 = vld [vmem:[#allocation12 + $0x2e8] ss:$16 sps:$4 sm:$0xff]  }
 0x30f   :  { %2997 = vmatpush1.bf16.msra.mxu0 %v4249_v59 }
 0x310   :  { %2998 = vmatprep.subr.bf16.mxu0 %v4254_v62 }
 0x313   :  { %2999 = vmatpush1.bf16.msra.mxu0 %v4252_v3  ;;  %v4305_v3 = vld [vmem:[#allocation12 + $0x30c] ss:$16 sps:$4 sm:$0xff]  }
 0x314   :  { %3000 = vmatprep.subr.bf16.mxu0 %v4257_v1 }
 0x317   :  { %3001 = vmatpush1.bf16.msra.mxu0 %v4255_v36  ;;  %v4303_v36 = vld [vmem:[#allocation12 + $0x308] ss:$16 sps:$4 sm:$0xff]  }
 0x318   :  { %3002 = vmatprep.subr.bf16.mxu0 %v4260_v40  ;;  %v4308_v40 = vld [vmem:[#allocation12 + $0x32c] ss:$16 sps:$4 sm:$0xff]  }
 0x31b   :  { %3003 = vmatpush1.bf16.msra.mxu0 %v4258_v45  ;;  %v4306_v45 = vld [vmem:[#allocation12 + $0x328] ss:$16 sps:$4 sm:$0xff]  }
 0x31c   :  { %3004 = vmatprep.subr.bf16.mxu0 %v4263_v4  ;;  %v4311_v4 = vld [vmem:[#allocation12 + $0x34c] ss:$16 sps:$4 sm:$0xff]  }
 0x31f   :  { %3005 = vmatpush1.bf16.msra.mxu0 %v4261_v10  ;;  %v4309_v10 = vld [vmem:[#allocation12 + $0x348] ss:$16 sps:$4 sm:$0xff]  }
 0x320   :  { %3006 = vmatprep.subr.bf16.mxu0 %v4266_v21  ;;  %v4314_v21 = vld [vmem:[#allocation12 + $0x36c] ss:$16 sps:$4 sm:$0xff]  }
 0x323   :  { %3007 = vmatpush1.bf16.msra.mxu0 %v4264_v57  ;;  %v4312_v57 = vld [vmem:[#allocation12 + $0x368] ss:$16 sps:$4 sm:$0xff]  }
 0x324   :  { %3008 = vmatprep.subr.bf16.mxu0 %v4269_v18  ;;  %v4317_v18 = vld [vmem:[#allocation12 + $0x38c] ss:$16 sps:$4 sm:$0xff]  }
 0x327   :  { %3009 = vmatpush1.bf16.msra.mxu0 %v4267_v11  ;;  %v4315_v11 = vld [vmem:[#allocation12 + $0x388] ss:$16 sps:$4 sm:$0xff]  }
 0x328   :  { %3010 = vmatprep.subr.bf16.mxu0 %v4272_v48  ;;  %v4320_v48 = vld [vmem:[#allocation12 + $0x3ac] ss:$16 sps:$4 sm:$0xff]  }
 0x32b   :  { %3011 = vmatpush1.bf16.msra.mxu0 %v4270_v20  ;;  %v148_v20 = vld [vmem:[#allocation15 + $0xb] sm:$0xf] }
 0x32c   :  { %3012 = vmatprep.subr.bf16.mxu0 %v4275_v31  ;;  %v4318_v31 = vld [vmem:[#allocation12 + $0x3a8] ss:$16 sps:$4 sm:$0xff]  }
 0x32f   :  { %3013 = vmatpush1.bf16.msra.mxu0 %v4273_v13  ;;  %v3074_v13 = vrot.slane %v148_v20, %v242_v30  ;;  %v4324_v30 = vld [vmem:[#allocation12 + $0x3e8] ss:$16 sps:$4 sm:$0xff]  }
 0x330   :  { %3014 = vmatprep.subr.bf16.mxu0 %v4278_v22  ;;  %v3078_v22 = vrot.slane %v148_v20, %v246_v32 }
 0x333   :  { %3015 = vmatpush1.bf16.msra.mxu0 %v4276_v23 }
 0x334   :  { %3027 = vmatprep.subr.bf16.mxu0 %v4281_v0  ;;  %v4321_v0 = vld [vmem:[#allocation12 + $0x3c8] ss:$16 sps:$4 sm:$0xff]  }
 0x336   :  { %3017 = vmatmul.mubr.bf16.vlgmr.msra.gmra.mrb[40].mxu0 %v4835_v56  ;;  %v3404_v56 = vld [vmem:[#allocation15 + $0xa] ss:$0 sm:$0xff] }
 0x337   :  { %3028 = vmatpush1.bf16.msra.mxu0 %v4279_v44  ;;  %3059 = vmatprep.mubr.bf16.mxu0 %v4884_v16  ;;  %v4299_v16 = vld [vmem:[#allocation12 + $0x2cc] ss:$16 sps:$4 sm:$0xff]  }
 0x338   :  { %3029 = vmatprep.subr.bf16.mxu0 %v4284_v26 }
 0x33b   :  { %3030 = vmatpush1.bf16.msra.mxu0 %v4282_v46  ;;  %v4326_v46 = vld [vmem:[#allocation12 + $0x3ec] ss:$16 sps:$4 sm:$0xff]  }
 0x33c   :  { %3031 = vmatprep.subr.bf16.mxu0 %v4287_v42 }
 0x33f   :  { %3032 = vmatpush1.bf16.msra.mxu0 %v4285_v28 }
 0x340   :  { %3033 = vmatprep.subr.bf16.mxu0 %v4290_v7 }
 0x343   :  { %3034 = vmatpush1.bf16.msra.mxu0 %v4288_v35 }
 0x344   :  { %3035 = vmatprep.subr.bf16.mxu0 %v4293_v37 }
 0x347   :  { %3036 = vmatpush1.bf16.msra.mxu0 %v4291_v38 }
 0x348   :  { %3037 = vmatprep.subr.bf16.mxu0 %v4296_v39 }
 0x349   :  { %v3766_v17 = vpop.f32.mrb[36].mxu0 }
 0x34a   :  { %v1176_v43 = vadd.f32 %v3766_v17, %v3404_v56  ;;  %v1167_v63 = vpop.f32.mrb[37].mxu0 }
 0x34b   :  { %v1168_v25 = vadd.f32 %v3404_v56, %v1167_v63  ;;  %3038 = vmatpush1.bf16.msra.mxu0 %v4294_v55  ;;  %v3767_v14 = vpop.f32.mrb[38].mxu0 }
 0x34c   :  { %v1179_v49 = vadd.f32 %v3767_v14, %v3404_v56  ;;  %v1170_v50 = vpop.f32.mrb[39].mxu0  ;;  %3039 = vmatprep.subr.bf16.mxu0 %v4299_v16  ;;  %v3105_v9 = vmul.f32 %v1176_v43, %v1176_v43 }
 0x34d   :  { %v1171_v58 = vadd.f32 %v3404_v56, %v1170_v50  ;;  %v3099_v19 = vmul.f32 %v1168_v25, %v1168_v25  ;;  %v3111_v24 = vmul.f32 %v1176_v43, %v1168_v25 }
 0x34e   :  { %3107 = vadd.xlane.f32.xlu1 %v3105_v9  ;;  %v3106_v62 = vmul.f32 %v1179_v49, %v1179_v49 }
 0x34f   :  { %3040 = vmatpush1.bf16.msra.mxu0 %v4297_v51  ;;  %3101 = vadd.xlane.f32.xlu0 %v3099_v19  ;;  %v3112_v59 = vmul.f32 %v1179_v49, %v1171_v58  ;;  %v3100_v1 = vmul.f32 %v1171_v58, %v1171_v58 }
 0x350   :  { %3041 = vmatprep.subr.bf16.mxu0 %v4302_v54 }
 0x352   :  { %3109 = vadd.xlane.f32.xlu1 %v3106_v62 }
 0x353   :  { %3042 = vmatpush1.bf16.msra.mxu0 %v4300_v15  ;;  %3103 = vadd.xlane.f32.xlu0 %v3100_v1  ;;  %v3082_v1 = vrot.slane %v148_v20, %v250_v33 }
 0x354   :  { %3043 = vmatprep.subr.bf16.mxu0 %v4305_v3 }
 0x356   :  { %3115 = vadd.xlane.f32.xlu1 %v3112_v59 }
 0x357   :  { %3044 = vmatpush1.bf16.msra.mxu0 %v4303_v36  ;;  %3113 = vadd.xlane.f32.xlu0 %v3111_v24  ;;  %v3086_v36 = vrot.slane %v148_v20, %v254_v34 }
 0x358   :  { %3045 = vmatprep.subr.bf16.mxu0 %v4308_v40 }
 0x35a   :  { %3186 = vadd.xlane.f32.xlu1 %v4968_v53  ;;  %v4323_v53 = vld [vmem:[#allocation12 + $0x3cc] ss:$16 sps:$4 sm:$0xff]  }
 0x35b   :  { %3046 = vmatpush1.bf16.msra.mxu0 %v4306_v45 }
 0x35c   :  { %3047 = vmatprep.subr.bf16.mxu0 %v4311_v4 }
 0x35f   :  { %3048 = vmatpush1.bf16.msra.mxu0 %v4309_v10 }
 0x360   :  { %3049 = vmatprep.subr.bf16.mxu0 %v4314_v21 }
 0x363   :  { %3050 = vmatpush1.bf16.msra.mxu0 %v4312_v57 }
 0x364   :  { %3051 = vmatprep.subr.bf16.mxu0 %v4317_v18 }
 0x367   :  { %3052 = vmatpush1.bf16.msra.mxu0 %v4315_v11 }
 0x368   :  { %3053 = vmatprep.subr.bf16.mxu0 %v4320_v48 }
 0x36b   :  { %v2975_v23 = vpop.f32.mrb[28].mxu1  ;;  %3054 = vmatpush1.bf16.msra.mxu0 %v4318_v31 }
 0x36c   :  { %v3091_v44 = vadd.f32 %v3074_v13, %v2975_v23  ;;  %v2977_v26 = vpop.f32.mrb[29].mxu1  ;;  %3055 = vmatprep.subr.bf16.mxu0 %v4323_v53 }
 0x36d   :  { %v3092_v42 = vadd.f32 %v3078_v22, %v2977_v26  ;;  %v2979_v28 = vpop.f32.mrb[30].mxu1 }
 0x36e   :  { %v3163_v7 = vsub.f32 %v3091_v44, %v4907_v2  ;;  %v2981_v35 = vpop.f32.mrb[31].mxu1  ;;  %v3095_v45 = vadd.f32 %v3074_v13, %v2979_v28 }
 0x36f   :  { %v3164_v37 = vsub.f32 %v3092_v42, %v4910_v5  ;;  %3056 = vmatpush1.bf16.msra.mxu0 %v4321_v0  ;;  %v3096_v18 = vadd.f32 %v3078_v22, %v2981_v35 }
 0x370   :  { %v3225_v38 = vmul.f32 %v3163_v7, %v3163_v7  ;;  %3057 = vmatprep.subr.bf16.mxu0 %v4326_v46 }
 0x371   :  { %v3226_v39 = vmul.f32 %v3164_v37, %v3164_v37  ;;  %v3168_v29 = vsub.f32 %v3096_v18, %v4935_v8 }
 0x373   :  { %v3233_v32 = vadd.f32 %v3226_v39, %v3225_v38  ;;  %3058 = vmatpush1.bf16.msra.mxu0 %v4324_v30  ;;  %v3230_v44 = vmul.f32 %v3168_v29, %v3168_v29 }
 0x376   :  { %3060 = vmatmul.mubr.bf16.vlgmr.msra.gmra.mrb[40].mxu0 %v4845_v61 }
 0x3db   :  { %v3108_v56 = vpop.xlane.xlu1 %3107 }
 0x3dc   :  { %v3102_v55 = vpop.xlane.xlu0 %3101  ;;  %v3123_v16 = vmax.f32 %v3108_v56, 1e-24 }
 0x3dd   :  { %v3117_v17 = vmax.f32 %v3102_v55, 1e-24 }
 0x3df   :  { %4327 = vrsqrt.f32 %v3117_v17  ;;  %v3110_v43 = vpop.xlane.xlu1 %3109 }
 0x3e0   :  { %v3104_v63 = vpop.xlane.xlu0 %3103  ;;  %4329 = vrsqrt.f32 %v3123_v16  ;;  %v3124_v2 = vmax.f32 %v3110_v43, 1e-24 }
 0x3e1   :  { %v3118_v25 = vmax.f32 %v3104_v63, 1e-24 }
 0x3e3   :  { %4331 = vrsqrt.f32 %v3118_v25  ;;  %v3116_v54 = vpop.xlane.xlu1 %3115 }
 0x3e4   :  { %4333 = vrsqrt.f32 %v3124_v2  ;;  %v3114_v14 = vpop.xlane.xlu0 %3113 }
 0x3e7   :  { %v3187_v28 = vpop.xlane.xlu1 %3186 }
 0x3e8   :  { %v3188_v7 = vrot.slane %v3187_v28, 4 }
 0x3e9   :  { %v4328_v5 = vpop.eup %4327 }
 0x3ea   :  { %v3121_v51 = vmul.f32 %v4328_v5, %v3114_v14  ;;  %v4330_v49 = vpop.eup %4329  ;;  %v3189_v35 = vadd.f32 %v3188_v7, %v3187_v28 }
 0x3ec   :  { %v3127_v50 = vmul.f32 %v4330_v49, %v3121_v51  ;;  %v3190_v8 = vrot.slane %v3189_v35, 2 }
 0x3ed   :  { %v4332_v9 = vpop.eup %4331 }
 0x3ee   :  { %v3122_v61 = vmul.f32 %v4332_v9, %v3116_v54  ;;  %v4334_v58 = vpop.eup %4333  ;;  %v3129_v24 = vsub.f32 1.0, %v3127_v50 }
 0x3f0   :  { %v3128_v19 = vmul.f32 %v4334_v58, %v3122_v61  ;;  %v3132_v59 = vsel %vm3131_vm1, %v3129_v24, 0.0 }
 0x3f2   :  { %v3130_v15 = vsub.f32 1.0, %v3128_v19 }
 0x3f4   :  { %v3133_v62 = vsel %vm3131_vm1, %v3130_v15, 0.0 }
 0x3f5   :  { %v3134_v3 = vadd.f32 %v3133_v62, %v3132_v59 }
 0x3f7   :  { %3135 = vadd.xlane.f32.xlu0 %v3134_v3 }
 0x3fb   :  { %3213 = vadd.xlane.f32.xlu0 %v4970_v6 }
 0x3ff   :  { %3266 = vadd.xlane.f32.xlu0 %v4875_v60  ;;  %v3167_v60 = vsub.f32 %v3095_v45, %v4932_v27 }
 0x401   :  { %v3229_v13 = vmul.f32 %v3167_v60, %v3167_v60 }
 0x449   :  { %v3061_v40 = vpop.f32.mrb[40].mxu0 }
 0x44a   :  { %v3093_v4 = vadd.f32 %v3082_v1, %v3061_v40  ;;  %v3063_v10 = vpop.f32.mrb[41].mxu0 }
 0x44b   :  { %v3094_v21 = vadd.f32 %v3086_v36, %v3063_v10  ;;  %v3065_v57 = vpop.f32.mrb[42].mxu0 }
 0x44c   :  { %v3165_v11 = vsub.f32 %v3093_v4, %v4917_v12  ;;  %v3067_v48 = vpop.f32.mrb[43].mxu0  ;;  %v3097_v53 = vadd.f32 %v3082_v1, %v3065_v57 }
 0x44d   :  { %v3166_v6 = vsub.f32 %v3094_v21, %v4942_v41  ;;  %v3098_v20 = vadd.f32 %v3086_v36, %v3067_v48 }
 0x44e   :  { %v3227_v31 = vmul.f32 %v3165_v11, %v3165_v11  ;;  %v3169_v0 = vsub.f32 %v3097_v53, %v4939_v47 }
 0x44f   :  { %v3228_v33 = vmul.f32 %v3166_v6, %v3166_v6  ;;  %v3170_v12 = vsub.f32 %v3098_v20, %v4956_v52 }
 0x450   :  { %v3234_v34 = vadd.f32 %v3233_v32, %v3227_v31  ;;  %v3231_v26 = vmul.f32 %v3169_v0, %v3169_v0  ;;  %v3191_v32 = vadd.f32 %v3190_v8, %v3189_v35 }
 0x451   :  { %v3232_v41 = vmul.f32 %v3170_v12, %v3170_v12 }
 0x452   :  { %v3235_v23 = vadd.f32 %v3234_v34, %v3228_v33  ;;  %v3192_v52 = vrot.slane %v3191_v32, 1 }
 0x454   :  { %v3236_v22 = vadd.f32 %v3235_v23, %v3229_v13  ;;  %v3193_v25 = vadd.f32 %v3192_v52, %v3191_v32 }
 0x456   :  { %v3237_v46 = vadd.f32 %v3236_v22, %v3230_v44 }
 0x458   :  { %v3238_v42 = vadd.f32 %v3237_v46, %v3231_v26 }
 0x45a   :  { %v3239_v27 = vadd.f32 %v3238_v42, %v3232_v41 }
 0x45c   :  { %3240 = vadd.xlane.f32.xlu1 %v3239_v27 }
 0x484   :  { %v3136_v37 = vpop.xlane.xlu0 %3135 }
 0x485   :  { %v3137_v30 = vrot.slane %v3136_v37, 4 }
 0x487   :  { %v3138_v38 = vadd.f32 %v3137_v30, %v3136_v37 }
 0x488   :  { %v3214_v39 = vpop.xlane.xlu0 %3213 }
 0x489   :  { %v3139_v47 = vrot.slane %v3138_v38, 2  ;;  %v3215_v56 = vrot.slane %v3214_v39, 4 }
 0x48b   :  { %v3216_v55 = vadd.f32 %v3215_v56, %v3214_v39  ;;  %v3140_v16 = vadd.f32 %v3139_v47, %v3138_v38 }
 0x48d   :  { %v3217_v17 = vrot.slane %v3216_v55, 2  ;;  %v3141_v43 = vrot.slane %v3140_v16, 1 }
 0x48f   :  { %v3142_v63 = vadd.f32 %v3141_v43, %v3140_v16  ;;  %v3218_v2 = vadd.f32 %v3217_v17, %v3216_v55 }
 0x491   :  { %3792 = vpush %v3142_v63  ;;  %v3219_v5 = vrot.slane %v3218_v2, 1 }
 0x492   :  { %3794 = vpush %v3193_v25 }
 0x493   :  { %v3220_v14 = vadd.f32 %v3219_v5, %v3218_v2 }
 0x495   :  { %3796 = vpush %v3220_v14 }
 0x496   :  { %4522 = shalt.err (!%p4519_p12)
}
 0x497   :  { %s4523_s26 = scalar_lea.hbm %s5040_s9, 512 }
 0x498   :  { %p4524_p13 = scmp.ne.s32.totalorder %s5040_s9, %s4523_s26  ;;  %p4527_p0 = scmp.lt.u32.totalorder %s4523_s26, %s5040_s9 }
 0x49a   :  { %p4529_p1 = pnand %p4527_p0, %p4524_p13 }
 0x49c   :  { %4532 = shalt.err (!%p4529_p1)
}
 0x49d   :  { %3299 = dma.vmem_to_hbm [thread:$0]  %s3294_s23, 512, %s5040_s9, [#allocation4], %s4564_s4, %s4564_s4, %s4565_s16   ;;  %v3267_v51 = vpop.xlane.xlu0 %3266 }
 0x49e   :  { %v3268_v49 = vrot.slane %v3267_v51, 4  ;;  %s4533_s19 = scalar_lea.hbm %s5041_s10, 16 }
 0x49f   :  { %p4534_p2 = scmp.ne.s32.totalorder %s5041_s10, %s4533_s19  ;;  %p4537_p3 = scmp.lt.u32.totalorder %s4533_s19, %s5041_s10 }
 0x4a0   :  { %v3269_v50 = vadd.f32 %v3268_v49, %v3267_v51 }
 0x4a1   :  { %p4539_p4 = pnand %p4537_p3, %p4534_p2 }
 0x4a2   :  { %v3270_v9 = vrot.slane %v3269_v50, 2 }
 0x4a4   :  { %v3271_v19 = vadd.f32 %v3270_v9, %v3269_v50 }
 0x4a6   :  { %v3272_v59 = vrot.slane %v3271_v19, 1 }
 0x4a8   :  { %v3273_v1 = vadd.f32 %v3272_v59, %v3271_v19 }
 0x4c2   :  { %s3793_s29 = spop %3792 }
 0x4c3   :  { %s3795_s6 = spop %3794  ;;  %s3146_s22 = smul.f32 0.0625, %s3793_s29 }
 0x4c4   :  { %s3197_s4 = smul.f32 0.00012207031, %s3795_s6 }
 0x4c6   :  { %s3797_s9 = spop %3796  ;;  %s3278_s11 = sadd.f32 %s3197_s4, %s3146_s22 }
 0x4c7   :  { %s3224_s16 = smul.f32 0.00012207031, %s3797_s9 }
 0x4c9   :  { %s3279_s12 = sadd.f32 %s3278_s11, %s3224_s16 }
 0x4e9   :  { %v3241_v54 = vpop.xlane.xlu1 %3240 }
 0x4ea   :  { %v3242_v61 = vrot.slane %v3241_v54, 4 }
 0x4ec   :  { %v3243_v58 = vadd.f32 %v3242_v61, %v3241_v54 }
 0x4ee   :  { %v3244_v24 = vrot.slane %v3243_v58, 2 }
 0x4f0   :  { %v3245_v15 = vadd.f32 %v3244_v24, %v3243_v58 }
 0x4f2   :  { %v3246_v62 = vrot.slane %v3245_v15, 1 }
 0x4f4   :  { %v3247_v3 = vadd.f32 %v3246_v62, %v3245_v15 }
 0x4f6   :  { %3798 = vpush %v3247_v3 }
 0x4f7   :  { %3800 = vpush %v3273_v1 }
 0x527   :  { %s3799_s13 = spop %3798 }
 0x528   :  { %s3251_s15 = smul.f32 0.00012207031, %s3799_s13  ;;  %s3801_s17 = spop %3800 }
 0x529   :  { %s3277_s30 = smul.f32 0.06666667, %s3801_s17 }
 0x52a   :  { %s3280_s7 = sadd.f32 %s3279_s12, %s3251_s15 }
 0x52c   :  { %s3281_s3 = sadd.f32 %s3280_s7, %s3277_s30 }
 0x52e   :  { %3283 = sst [smem:[#allocation18]] %s3281_s3 }
 0x52f   :  { %4542 = shalt.err (!%p4539_p4)
}
 0x530   :  { %s4577_s1 = smov [#allocation18]  }
 0x531   :  { %3307 = dma.smem_to_hbm %s4577_s1, 16, %s5041_s10, [#allocation5]  }
 0x532   :  { %4553 = dma.done.wait [#allocation4], 512  }
 0x533   :  { %4554 = vsyncadd [#allocation4], 4294966784 }
 0x534   :  { %4555 = dma.done.wait [#allocation5], 16  }
 0x535   :  { %4556 = vsyncadd [#allocation5], 4294967280 }
 0x536   :  { %3314 = sfence }
 0x537   :  { %3315 = vsyncpa [#allocation3], 1 }
 0x538   :  { %3316 = vsyncpa [#allocation7], 1 }
 0x539   :  { %3317 = vsyncpa [#allocation10], 1 }
 0x53a   :  { %3318 = vsyncpa [#allocation13], 1 }
 0x53b   :  { %3319 = vsyncpa [#allocation16], 1 }
 0x53c   :  { %3320 = vsyncpa [#allocation4], 1 }
 0x53d   :  { %3321 = vsyncpa [#allocation5], 1 }

</bundles_post_ra>
